<compile_context>
chip_gen: v6e
topology: v6e:2x2x1
jax: 0.10.0
libtpu: 0.0.40
codegen_flags: <defaults>
</compile_context>

<pallas_src>
import functools
from math import sqrt

import jax
import jax.numpy as jnp
from jax import lax
from jax.experimental import pallas as pl
from jax.experimental.pallas import tpu as pltpu


def _flash_attention_kernel(q_ref, k_ref, v_ref, o_ref, m_ref, l_ref, acc_ref,
                            *, scale, mask_flag, block_q, block_k):
    """One grid step of flash attention for a single (batch, head, q-tile, kv-tile).

    q_ref: (block_q, E)    k_ref: (block_k, E)    v_ref: (block_k, D)
    o_ref: (block_q, D)
    m_ref/l_ref: (block_q, 1) f32 running max / running sum
    acc_ref:     (block_q, D) f32 running (unnormalized) output
    """
    qi = pl.program_id(2)          # query-tile index
    ki = pl.program_id(3)          # kv-tile index (innermost, "arbitrary")
    nk = pl.num_programs(3)

    @pl.when(ki == 0)
    def _init():
        m_ref[...] = jnp.full(m_ref.shape, -jnp.inf, jnp.float32)
        l_ref[...] = jnp.zeros(l_ref.shape, jnp.float32)
        acc_ref[...] = jnp.zeros(acc_ref.shape, jnp.float32)

    def _step(apply_mask):
        # Fold the softmax scale into q (native dtype preserved by weak typing);
        # feed the MXU native-dtype operands with f32 accumulation.
        q = q_ref[...] * scale
        s = lax.dot_general(q, k_ref[...], (((1,), (1,)), ((), ())),
                            preferred_element_type=jnp.float32)      # (bq, bk) f32

        if apply_mask:  # only emitted for diagonal-straddling blocks
            row = qi * block_q + lax.broadcasted_iota(jnp.int32, s.shape, 0)
            col = ki * block_k + lax.broadcasted_iota(jnp.int32, s.shape, 1)
            s = jnp.where(col > row, -jnp.inf, s)

        m_prev = m_ref[...]
        m_new = jnp.maximum(m_prev, jnp.max(s, axis=-1, keepdims=True))
        alpha = jnp.exp(m_prev - m_new)                               # EUP
        p = jnp.exp(s - m_new)                                        # EUP
        l_ref[...] = alpha * l_ref[...] + jnp.sum(p, axis=-1, keepdims=True)
        pv = lax.dot_general(p.astype(v_ref.dtype), v_ref[...],
                             (((1,), (0,)), ((), ())),
                             preferred_element_type=jnp.float32)      # (bq, D) f32
        acc_ref[...] = alpha * acc_ref[...] + pv
        m_ref[...] = m_new

    if mask_flag:
        q_first = qi * block_q
        q_last = q_first + (block_q - 1)
        k_first = ki * block_k
        k_last = k_first + (block_k - 1)
        fully_unmasked = k_last <= q_first                 # strictly below diagonal
        straddles = jnp.logical_and(k_first <= q_last,
                                    jnp.logical_not(fully_unmasked))
        # Blocks with k_first > q_last are fully masked -> skipped entirely
        # (no MXU, no softmax work).
        pl.when(fully_unmasked)(lambda: _step(False))
        pl.when(straddles)(lambda: _step(True))
    else:
        _step(False)

    # TODO(synk): nn.Dropout(0.1) is identity in eval mode; training-time dropout
    # (pltpu.prng_seed + pltpu.prng_random_bits on p) is not applied here.

    @pl.when(ki == nk - 1)
    def _finalize():
        # One approximate reciprocal (EUP vrcp) per (block_q, 1) tile.
        # Causal rows always have >= 1 unmasked column, so l >= 1 (no 0/0).
        inv_l = pl.reciprocal(l_ref[...], approx=True)
        o_ref[...] = (acc_ref[...] * inv_l).astype(o_ref.dtype)


def _pick_tile(dim, preferred):
    for t in preferred:
        if dim % t == 0:
            return t
    return dim  # full dim is always a legal block size


def _vmem_limit_bytes(tq, tk, E, D, in_itemsize, out_itemsize):
    # Double-buffered input/output blocks + f32 scratch + score/prob temporaries.
    blocks = 2 * (tq * E + tk * E + tk * D) * in_itemsize + 2 * tq * D * out_itemsize
    scratch = (2 * tq + tq * D) * 4
    temps = 4 * tq * tk * 4
    need = blocks + scratch + temps
    # Defaults are 16 MiB (v5e) / 32 MiB (v6e, v7x); keep within v7x's 64 MiB VMEM.
    return int(min(64 * 1024 * 1024, max(32 * 1024 * 1024, 2 * need)))


def full_attention(queries, keys, values, *, mask_flag=True, scale=None,
                   block_q=None, block_k=None):
    """Pallas equivalent of FullAttention.forward (attn_mask=None path).

    queries: (B, L, H, E), keys: (B, S, H, E), values: (B, S, H, D)
    returns: (B, L, H, D)
    """
    B, L, H, E = queries.shape
    _, S, _, D = values.shape
    scale_val = float(scale) if scale is not None else 1.0 / sqrt(E)

    # Default tiles are sized conservatively for v7x (64 MiB VMEM); on v6e/v5e
    # (128 MiB VMEM) larger block_k (512-1024, or whole S) amortizes per-step
    # overhead and cuts K/V re-reads — pass block_q / block_k to override.
    tq = block_q if block_q is not None else _pick_tile(L, (256, 128, 64, 32, 16, 8))
    tk = block_k if block_k is not None else _pick_tile(S, (512, 256, 128, 64, 32, 16, 8))
    assert L % tq == 0 and S % tk == 0, "block sizes must divide L and S"

    # Layout glue: head-major so each grid point owns dense lane-major blocks.
    # TODO(synk): hoist these transposes upstream to avoid the extra HBM passes.
    q = jnp.transpose(queries, (0, 2, 1, 3))  # (B, H, L, E)
    k = jnp.transpose(keys, (0, 2, 1, 3))     # (B, H, S, E)
    v = jnp.transpose(values, (0, 2, 1, 3))   # (B, H, S, D)

    kernel = functools.partial(
        _flash_attention_kernel,
        scale=scale_val, mask_flag=mask_flag, block_q=tq, block_k=tk,
    )

    in_itemsize = jnp.dtype(queries.dtype).itemsize

    out_bhld = pl.pallas_call(
        kernel,
        out_shape=jax.ShapeDtypeStruct((B, H, L, D), queries.dtype),
        grid_spec=pltpu.PrefetchScalarGridSpec(
            num_scalar_prefetch=0,
            grid=(B, H, L // tq, S // tk),
            in_specs=[
                pl.BlockSpec((None, None, tq, E), lambda b, h, qi, ki: (b, h, qi, 0)),
                # K/V stream along the innermost axis; sweep pl.Buffered(3) here if
                # profiles show exposed DMA (costs extra VMEM — check on v7x).
                pl.BlockSpec((None, None, tk, E), lambda b, h, qi, ki: (b, h, ki, 0)),
                pl.BlockSpec((None, None, tk, D), lambda b, h, qi, ki: (b, h, ki, 0)),
            ],
            out_specs=pl.BlockSpec((None, None, tq, D),
                                   lambda b, h, qi, ki: (b, h, qi, 0)),
            scratch_shapes=[
                pltpu.VMEM((tq, 1), jnp.float32),   # running max
                pltpu.VMEM((tq, 1), jnp.float32),   # running sum
                pltpu.VMEM((tq, D), jnp.float32),   # output accumulator
            ],
        ),
        compiler_params=pltpu.CompilerParams(
            dimension_semantics=("parallel", "parallel", "parallel", "arbitrary"),
            vmem_limit_bytes=_vmem_limit_bytes(tq, tk, E, D, in_itemsize, in_itemsize),
        ),
    )(q, k, v)

    return jnp.transpose(out_bhld, (0, 2, 1, 3))  # (B, L, H, D)


def _reference_full_attention(queries, keys, values, *, mask_flag=True, scale=None):
    B, L, H, E = queries.shape
    _, S, _, D = values.shape
    scale_val = scale if scale is not None else 1.0 / sqrt(E)
    scores = jnp.einsum("blhe,bshe->bhls", queries, keys)
    if mask_flag:
        causal = jnp.triu(jnp.ones((L, S), dtype=bool), k=1)
        scores = jnp.where(causal[None, None], -jnp.inf, scores)
    a = jax.nn.softmax(scale_val * scores, axis=-1)
    return jnp.einsum("bhls,bshd->blhd", a, values)


if __name__ == "__main__":
    B, L, S, H, E, D = 2, 256, 256, 4, 128, 128
    key = jax.random.PRNGKey(0)
    kq, kk, kv = jax.random.split(key, 3)
    queries = jax.random.normal(kq, (B, L, H, E), dtype=jnp.float32)
    keys = jax.random.normal(kk, (B, S, H, E), dtype=jnp.float32)
    values = jax.random.normal(kv, (B, S, H, D), dtype=jnp.float32)

    # Causal path, multiple q/kv tiles (exercises online softmax + block skipping).
    out = full_attention(queries, keys, values, mask_flag=True,
                         block_q=64, block_k=64)
    out = jax.block_until_ready(out)
    ref = _reference_full_attention(queries, keys, values, mask_flag=True)
    assert out.shape == (B, L, H, D)
    # Tolerance loosened for pl.reciprocal(approx=True) in the finalize step.
    assert jnp.allclose(out, ref, atol=1e-2, rtol=1e-2), "masked mismatch vs reference"

    # Unmasked path with default (single-tile) blocking.
    out2 = full_attention(queries, keys, values, mask_flag=False)
    out2 = jax.block_until_ready(out2)
    ref2 = _reference_full_attention(queries, keys, values, mask_flag=False)
    assert jnp.allclose(out2, ref2, atol=1e-2, rtol=1e-2), "unmasked mismatch vs reference"

    print("KERNEL_OK")
</pallas_src>

<mosaic_0001>
module attributes {stable_mosaic.version = 11 : i64} {
  func.func @_flash_attention_kernel(%arg0: i32, %arg1: i32, %arg2: i32, %arg3: i32, %arg4: memref<1x1x64x128xf32, #tpu.memory_space<vmem>>, %arg5: memref<1x1x64x128xf32, #tpu.memory_space<vmem>>, %arg6: memref<1x1x64x128xf32, #tpu.memory_space<vmem>>, %arg7: memref<1x1x64x128xf32, #tpu.memory_space<vmem>>, %arg8: memref<64x1xf32, #tpu.memory_space<vmem>>, %arg9: memref<64x1xf32, #tpu.memory_space<vmem>>, %arg10: memref<64x128xf32, #tpu.memory_space<vmem>>) attributes {dimension_semantics = [#tpu.dimension_semantics<parallel>, #tpu.dimension_semantics<parallel>, #tpu.dimension_semantics<parallel>, #tpu.dimension_semantics<arbitrary>], iteration_bounds = array<i64: 2, 4, 4, 4>, scalar_prefetch = 0 : i64, scratch_operands = 3 : i64, tpu.core_type = #tpu.core_type<tc>, window_params = [{transform_indices = @transform_0, window_bounds = array<i64: 1, 1, 64, 128>}, {transform_indices = @transform_1, window_bounds = array<i64: 1, 1, 64, 128>}, {transform_indices = @transform_2, window_bounds = array<i64: 1, 1, 64, 128>}, {transform_indices = @transform_3, window_bounds = array<i64: 1, 1, 64, 128>}]} {
    %c0_i32 = arith.constant 0 : i32
    %0 = arith.cmpi eq, %arg3, %c0_i32 : i32
    %1 = arith.extui %0 : i1 to i32
    %c0_i32_0 = arith.constant 0 : i32
    %2 = arith.cmpi ne, %1, %c0_i32_0 : i32
    scf.if %2 {
      %cst = arith.constant 0xFF800000 : f32
      %18 = vector.broadcast %cst : f32 to vector<64x1xf32>
      %c0 = arith.constant 0 : index
      %c0_6 = arith.constant 0 : index
      %19 = vector.load %arg8[%c0, %c0_6] : memref<64x1xf32, #tpu.memory_space<vmem>>, vector<64x1xf32>
      tpu.vector_store %arg8[%c0, %c0_6], %18 {strides = array<i32>} : memref<64x1xf32, #tpu.memory_space<vmem>>, vector<64x1xf32>,
      %cst_7 = arith.constant 0.000000e+00 : f32
      %20 = vector.broadcast %cst_7 : f32 to vector<64x1xf32>
      %c0_8 = arith.constant 0 : index
      %c0_9 = arith.constant 0 : index
      %21 = vector.load %arg9[%c0_8, %c0_9] : memref<64x1xf32, #tpu.memory_space<vmem>>, vector<64x1xf32>
      tpu.vector_store %arg9[%c0_8, %c0_9], %20 {strides = array<i32>} : memref<64x1xf32, #tpu.memory_space<vmem>>, vector<64x1xf32>,
      %cst_10 = arith.constant 0.000000e+00 : f32
      %22 = vector.broadcast %cst_10 : f32 to vector<64x128xf32>
      %c0_11 = arith.constant 0 : index
      %c0_12 = arith.constant 0 : index
      %23 = vector.load %arg10[%c0_11, %c0_12] : memref<64x128xf32, #tpu.memory_space<vmem>>, vector<64x128xf32>
      tpu.vector_store %arg10[%c0_11, %c0_12], %22 {strides = array<i32>} : memref<64x128xf32, #tpu.memory_space<vmem>>, vector<64x128xf32>,
    } else {
    }
    %c64_i32 = arith.constant 64 : i32
    %3 = arith.muli %arg2, %c64_i32 : i32
    %c63_i32 = arith.constant 63 : i32
    %4 = arith.addi %3, %c63_i32 : i32
    %c64_i32_1 = arith.constant 64 : i32
    %5 = arith.muli %arg3, %c64_i32_1 : i32
    %c63_i32_2 = arith.constant 63 : i32
    %6 = arith.addi %5, %c63_i32_2 : i32
    %7 = arith.cmpi sle, %6, %3 : i32
    %8 = arith.cmpi sle, %5, %4 : i32
    %true = arith.constant true
    %9 = arith.xori %7, %true : i1
    %10 = arith.andi %8, %9 : i1
    %11 = arith.extui %7 : i1 to i32
    %c0_i32_3 = arith.constant 0 : i32
    %12 = arith.cmpi ne, %11, %c0_i32_3 : i32
    scf.if %12 {
      %c0 = arith.constant 0 : index
      %c0_6 = arith.constant 0 : index
      %c0_7 = arith.constant 0 : index
      %c0_8 = arith.constant 0 : index
      %18 = vector.load %arg4[%c0, %c0_6, %c0_7, %c0_8] : memref<1x1x64x128xf32, #tpu.memory_space<vmem>>, vector<1x1x64x128xf32>
      %19 = vector.shape_cast %18 : vector<1x1x64x128xf32> to vector<64x128xf32>
      %cst = arith.constant 0.0883883461 : f32
      %20 = vector.broadcast %cst : f32 to vector<64x128xf32>
      %21 = arith.mulf %19, %20 : vector<64x128xf32>
      %c0_9 = arith.constant 0 : index
      %c0_10 = arith.constant 0 : index
      %c0_11 = arith.constant 0 : index
      %c0_12 = arith.constant 0 : index
      %22 = vector.load %arg5[%c0_9, %c0_10, %c0_11, %c0_12] : memref<1x1x64x128xf32, #tpu.memory_space<vmem>>, vector<1x1x64x128xf32>
      %23 = vector.shape_cast %22 : vector<1x1x64x128xf32> to vector<64x128xf32>
      %cst_13 = arith.constant dense<0.000000e+00> : vector<64x64xf32>
      %24 = tpu.matmul %21, %23, %cst_13 {dimension_numbers = #tpu.dot_dimension_numbers<[1], [1], [0], [0], [0, 0, 1, 0], [], []>} : vector<64x128xf32>, vector<64x128xf32>, vector<64x64xf32> -> vector<64x64xf32>
      %c0_14 = arith.constant 0 : index
      %c0_15 = arith.constant 0 : index
      %25 = vector.load %arg8[%c0_14, %c0_15] : memref<64x1xf32, #tpu.memory_space<vmem>>, vector<64x1xf32>
      %cst_16 = arith.constant dense<0xFF800000> : vector<64xf32>
      %26 = vector.multi_reduction <maximumf>, %24, %cst_16 [1] : vector<64x64xf32> to vector<64xf32>
      %27 = vector.shape_cast %26 : vector<64xf32> to vector<64x1xf32>
      %28 = arith.maximumf %25, %27 : vector<64x1xf32>
      %29 = arith.subf %25, %28 : vector<64x1xf32>
      %30 = math.exp %29 : vector<64x1xf32>
      %31 = vector.broadcast %28 : vector<64x1xf32> to vector<64x64xf32>
      %32 = arith.subf %24, %31 : vector<64x64xf32>
      %33 = math.exp %32 : vector<64x64xf32>
      %c0_17 = arith.constant 0 : index
      %c0_18 = arith.constant 0 : index
      %34 = vector.load %arg9[%c0_17, %c0_18] : memref<64x1xf32, #tpu.memory_space<vmem>>, vector<64x1xf32>
      %35 = arith.mulf %30, %34 : vector<64x1xf32>
      %cst_19 = arith.constant dense<0.000000e+00> : vector<64xf32>
      %36 = vector.multi_reduction <add>, %33, %cst_19 [1] : vector<64x64xf32> to vector<64xf32>
      %37 = vector.shape_cast %36 : vector<64xf32> to vector<64x1xf32>
      %38 = arith.addf %35, %37 : vector<64x1xf32>
      %c0_20 = arith.constant 0 : index
      %c0_21 = arith.constant 0 : index
      %39 = vector.load %arg9[%c0_20, %c0_21] : memref<64x1xf32, #tpu.memory_space<vmem>>, vector<64x1xf32>
      tpu.vector_store %arg9[%c0_20, %c0_21], %38 {strides = array<i32>} : memref<64x1xf32, #tpu.memory_space<vmem>>, vector<64x1xf32>,
      %c0_22 = arith.constant 0 : index
      %c0_23 = arith.constant 0 : index
      %c0_24 = arith.constant 0 : index
      %c0_25 = arith.constant 0 : index
      %40 = vector.load %arg6[%c0_22, %c0_23, %c0_24, %c0_25] : memref<1x1x64x128xf32, #tpu.memory_space<vmem>>, vector<1x1x64x128xf32>
      %41 = vector.shape_cast %40 : vector<1x1x64x128xf32> to vector<64x128xf32>
      %cst_26 = arith.constant dense<0.000000e+00> : vector<64x128xf32>
      %42 = tpu.matmul %33, %41, %cst_26 {dimension_numbers = #tpu.dot_dimension_numbers<[1], [0], [0], [1], [0, 0, 1, 1], [], []>} : vector<64x64xf32>, vector<64x128xf32>, vector<64x128xf32> -> vector<64x128xf32>
      %c0_27 = arith.constant 0 : index
      %c0_28 = arith.constant 0 : index
      %43 = vector.load %arg10[%c0_27, %c0_28] : memref<64x128xf32, #tpu.memory_space<vmem>>, vector<64x128xf32>
      %44 = vector.broadcast %30 : vector<64x1xf32> to vector<64x128xf32>
      %45 = arith.mulf %44, %43 : vector<64x128xf32>
      %46 = arith.addf %45, %42 : vector<64x128xf32>
      %c0_29 = arith.constant 0 : index
      %c0_30 = arith.constant 0 : index
      %47 = vector.load %arg10[%c0_29, %c0_30] : memref<64x128xf32, #tpu.memory_space<vmem>>, vector<64x128xf32>
      tpu.vector_store %arg10[%c0_29, %c0_30], %46 {strides = array<i32>} : memref<64x128xf32, #tpu.memory_space<vmem>>, vector<64x128xf32>,
      %c0_31 = arith.constant 0 : index
      %c0_32 = arith.constant 0 : index
      %48 = vector.load %arg8[%c0_31, %c0_32] : memref<64x1xf32, #tpu.memory_space<vmem>>, vector<64x1xf32>
      tpu.vector_store %arg8[%c0_31, %c0_32], %28 {strides = array<i32>} : memref<64x1xf32, #tpu.memory_space<vmem>>, vector<64x1xf32>,
    } else {
    }
    %13 = arith.extui %10 : i1 to i32
    %c0_i32_4 = arith.constant 0 : i32
    %14 = arith.cmpi ne, %13, %c0_i32_4 : i32
    scf.if %14 {
      %c0 = arith.constant 0 : index
      %c0_6 = arith.constant 0 : index
      %c0_7 = arith.constant 0 : index
      %c0_8 = arith.constant 0 : index
      %18 = vector.load %arg4[%c0, %c0_6, %c0_7, %c0_8] : memref<1x1x64x128xf32, #tpu.memory_space<vmem>>, vector<1x1x64x128xf32>
      %19 = vector.shape_cast %18 : vector<1x1x64x128xf32> to vector<64x128xf32>
      %cst = arith.constant 0.0883883461 : f32
      %20 = vector.broadcast %cst : f32 to vector<64x128xf32>
      %21 = arith.mulf %19, %20 : vector<64x128xf32>
      %c0_9 = arith.constant 0 : index
      %c0_10 = arith.constant 0 : index
      %c0_11 = arith.constant 0 : index
      %c0_12 = arith.constant 0 : index
      %22 = vector.load %arg5[%c0_9, %c0_10, %c0_11, %c0_12] : memref<1x1x64x128xf32, #tpu.memory_space<vmem>>, vector<1x1x64x128xf32>
      %23 = vector.shape_cast %22 : vector<1x1x64x128xf32> to vector<64x128xf32>
      %cst_13 = arith.constant dense<0.000000e+00> : vector<64x64xf32>
      %24 = tpu.matmul %21, %23, %cst_13 {dimension_numbers = #tpu.dot_dimension_numbers<[1], [1], [0], [0], [0, 0, 1, 0], [], []>} : vector<64x128xf32>, vector<64x128xf32>, vector<64x64xf32> -> vector<64x64xf32>
      %c64_i32_14 = arith.constant 64 : i32
      %25 = arith.muli %arg2, %c64_i32_14 : i32
      %26 = tpu.iota {dimensions = array<i32: 0>} : vector<64x64xi32>
      %27 = vector.broadcast %25 : i32 to vector<64x64xi32>
      %28 = arith.addi %27, %26 : vector<64x64xi32>
      %c64_i32_15 = arith.constant 64 : i32
      %29 = arith.muli %arg3, %c64_i32_15 : i32
      %30 = tpu.iota {dimensions = array<i32: 1>} : vector<64x64xi32>
      %31 = vector.broadcast %29 : i32 to vector<64x64xi32>
      %32 = arith.addi %31, %30 : vector<64x64xi32>
      %33 = arith.cmpi sgt, %32, %28 : vector<64x64xi32>
      %cst_16 = arith.constant 0xFF800000 : f32
      %34 = vector.broadcast %cst_16 : f32 to vector<64x64xf32>
      %35 = arith.select %33, %34, %24 : vector<64x64xi1>, vector<64x64xf32>
      %c0_17 = arith.constant 0 : index
      %c0_18 = arith.constant 0 : index
      %36 = vector.load %arg8[%c0_17, %c0_18] : memref<64x1xf32, #tpu.memory_space<vmem>>, vector<64x1xf32>
      %cst_19 = arith.constant dense<0xFF800000> : vector<64xf32>
      %37 = vector.multi_reduction <maximumf>, %35, %cst_19 [1] : vector<64x64xf32> to vector<64xf32>
      %38 = vector.shape_cast %37 : vector<64xf32> to vector<64x1xf32>
      %39 = arith.maximumf %36, %38 : vector<64x1xf32>
      %40 = arith.subf %36, %39 : vector<64x1xf32>
      %41 = math.exp %40 : vector<64x1xf32>
      %42 = vector.broadcast %39 : vector<64x1xf32> to vector<64x64xf32>
      %43 = arith.subf %35, %42 : vector<64x64xf32>
      %44 = math.exp %43 : vector<64x64xf32>
      %c0_20 = arith.constant 0 : index
      %c0_21 = arith.constant 0 : index
      %45 = vector.load %arg9[%c0_20, %c0_21] : memref<64x1xf32, #tpu.memory_space<vmem>>, vector<64x1xf32>
      %46 = arith.mulf %41, %45 : vector<64x1xf32>
      %cst_22 = arith.constant dense<0.000000e+00> : vector<64xf32>
      %47 = vector.multi_reduction <add>, %44, %cst_22 [1] : vector<64x64xf32> to vector<64xf32>
      %48 = vector.shape_cast %47 : vector<64xf32> to vector<64x1xf32>
      %49 = arith.addf %46, %48 : vector<64x1xf32>
      %c0_23 = arith.constant 0 : index
      %c0_24 = arith.constant 0 : index
      %50 = vector.load %arg9[%c0_23, %c0_24] : memref<64x1xf32, #tpu.memory_space<vmem>>, vector<64x1xf32>
      tpu.vector_store %arg9[%c0_23, %c0_24], %49 {strides = array<i32>} : memref<64x1xf32, #tpu.memory_space<vmem>>, vector<64x1xf32>,
      %c0_25 = arith.constant 0 : index
      %c0_26 = arith.constant 0 : index
      %c0_27 = arith.constant 0 : index
      %c0_28 = arith.constant 0 : index
      %51 = vector.load %arg6[%c0_25, %c0_26, %c0_27, %c0_28] : memref<1x1x64x128xf32, #tpu.memory_space<vmem>>, vector<1x1x64x128xf32>
      %52 = vector.shape_cast %51 : vector<1x1x64x128xf32> to vector<64x128xf32>
      %cst_29 = arith.constant dense<0.000000e+00> : vector<64x128xf32>
      %53 = tpu.matmul %44, %52, %cst_29 {dimension_numbers = #tpu.dot_dimension_numbers<[1], [0], [0], [1], [0, 0, 1, 1], [], []>} : vector<64x64xf32>, vector<64x128xf32>, vector<64x128xf32> -> vector<64x128xf32>
      %c0_30 = arith.constant 0 : index
      %c0_31 = arith.constant 0 : index
      %54 = vector.load %arg10[%c0_30, %c0_31] : memref<64x128xf32, #tpu.memory_space<vmem>>, vector<64x128xf32>
      %55 = vector.broadcast %41 : vector<64x1xf32> to vector<64x128xf32>
      %56 = arith.mulf %55, %54 : vector<64x128xf32>
      %57 = arith.addf %56, %53 : vector<64x128xf32>
      %c0_32 = arith.constant 0 : index
      %c0_33 = arith.constant 0 : index
      %58 = vector.load %arg10[%c0_32, %c0_33] : memref<64x128xf32, #tpu.memory_space<vmem>>, vector<64x128xf32>
      tpu.vector_store %arg10[%c0_32, %c0_33], %57 {strides = array<i32>} : memref<64x128xf32, #tpu.memory_space<vmem>>, vector<64x128xf32>,
      %c0_34 = arith.constant 0 : index
      %c0_35 = arith.constant 0 : index
      %59 = vector.load %arg8[%c0_34, %c0_35] : memref<64x1xf32, #tpu.memory_space<vmem>>, vector<64x1xf32>
      tpu.vector_store %arg8[%c0_34, %c0_35], %39 {strides = array<i32>} : memref<64x1xf32, #tpu.memory_space<vmem>>, vector<64x1xf32>,
    } else {
    }
    %c3_i32 = arith.constant 3 : i32
    %15 = arith.cmpi eq, %arg3, %c3_i32 : i32
    %16 = arith.extui %15 : i1 to i32
    %c0_i32_5 = arith.constant 0 : i32
    %17 = arith.cmpi ne, %16, %c0_i32_5 : i32
    scf.if %17 {
      %c0 = arith.constant 0 : index
      %c0_6 = arith.constant 0 : index
      %18 = vector.load %arg9[%c0, %c0_6] : memref<64x1xf32, #tpu.memory_space<vmem>>, vector<64x1xf32>
      %19 = tpu.reciprocal %18 {approx = true} : vector<64x1xf32> -> vector<64x1xf32>
      %c0_7 = arith.constant 0 : index
      %c0_8 = arith.constant 0 : index
      %20 = vector.load %arg10[%c0_7, %c0_8] : memref<64x128xf32, #tpu.memory_space<vmem>>, vector<64x128xf32>
      %21 = vector.broadcast %19 : vector<64x1xf32> to vector<64x128xf32>
      %22 = arith.mulf %20, %21 : vector<64x128xf32>
      %c0_9 = arith.constant 0 : index
      %c0_10 = arith.constant 0 : index
      %c0_11 = arith.constant 0 : index
      %c0_12 = arith.constant 0 : index
      %23 = vector.load %arg7[%c0_9, %c0_10, %c0_11, %c0_12] : memref<1x1x64x128xf32, #tpu.memory_space<vmem>>, vector<1x1x64x128xf32>
      %24 = vector.shape_cast %23 : vector<1x1x64x128xf32> to vector<64x128xf32>
      %25 = vector.shape_cast %22 : vector<64x128xf32> to vector<1x1x64x128xf32>
      tpu.vector_store %arg7[%c0_9, %c0_10, %c0_11, %c0_12], %25 {strides = array<i32>} : memref<1x1x64x128xf32, #tpu.memory_space<vmem>>, vector<1x1x64x128xf32>,
    } else {
    }
    return
  }
  func.func @transform_0(%arg0: i32, %arg1: i32, %arg2: i32, %arg3: i32) -> (i32, i32, i32, i32) {
    %c0_i32 = arith.constant 0 : i32
    %c0_i32_0 = arith.constant 0 : i32
    return %arg0, %arg1, %arg2, %c0_i32 : i32, i32, i32, i32
  }
  func.func @transform_1(%arg0: i32, %arg1: i32, %arg2: i32, %arg3: i32) -> (i32, i32, i32, i32) {
    %c0_i32 = arith.constant 0 : i32
    %c0_i32_0 = arith.constant 0 : i32
    return %arg0, %arg1, %arg3, %c0_i32 : i32, i32, i32, i32
  }
  func.func @transform_2(%arg0: i32, %arg1: i32, %arg2: i32, %arg3: i32) -> (i32, i32, i32, i32) {
    %c0_i32 = arith.constant 0 : i32
    %c0_i32_0 = arith.constant 0 : i32
    return %arg0, %arg1, %arg3, %c0_i32 : i32, i32, i32, i32
  }
  func.func @transform_3(%arg0: i32, %arg1: i32, %arg2: i32, %arg3: i32) -> (i32, i32, i32, i32) {
    %c0_i32 = arith.constant 0 : i32
    %c0_i32_0 = arith.constant 0 : i32
    return %arg0, %arg1, %arg2, %c0_i32 : i32, i32, i32, i32
  }
}

</mosaic_0001>

<bundles_post_ra>
// kernel: tpu_custom_call.1
= control target key start
LH: loop header
LB: loop body
LE: loop exit
PB: predicated region body
PF: predicated region fallthrough
CT: control target
= control target key end

     0   :  { %s3236_s0 = inlined_call_operand.hbm [shape: f32[2,4,256,128], index: 0, kind: input, shape index: {}]   ;;  %s3237_s1 = inlined_call_operand.hbm [shape: f32[2,4,256,128], index: 1, kind: input, shape index: {}]   ;;  %s3238_s2 = inlined_call_operand.hbm [shape: f32[2,4,256,128], index: 2, kind: input, shape index: {}]   ;;  %s3239_s3 = inlined_call_operand.hbm [shape: f32[2,4,256,128], index: 3, kind: output, shape index: {}]  }
   0x1   :  { %3267 = sst [smem:[#allocation33_spill]] %s3236_s0 }
   0x2   :  { %3268 = sst [smem:[#allocation34_spill]] %s3237_s1 }
   0x3   :  { %3269 = sst [smem:[#allocation35_spill]] %s3238_s2 }
   0x4   :  { %3270 = sst [smem:[#allocation36_spill]] %s3239_s3 }
   0x5   :  { %8 = vsyncpa [#allocation6], 0 }
   0x6   :  { %10 = vsyncpa [#allocation6 + $0x1], 0 }
   0x7   :  { %11 = vsyncpa [#allocation9], 0 }
   0x8   :  { %13 = vsyncpa [#allocation9 + $0x1], 0 }
   0x9   :  { %14 = vsyncpa [#allocation7], 0 }
   0xa   :  { %16 = vsyncpa [#allocation7 + $0x1], 0  ;;  %s2472_s12 = smov 0   ;;  %s2474_s13 = smov 0  }
   0xb   :  { %s2476_s14 = smov 0   ;;  %s2478_s15 = smov 0  }
   0xc   :  { %s2480_s16 = smov 0   ;;  %s2482_s17 = smov 0  }
   0xd   :  { %s2484_s18 = smov 0   ;;  %s2486_s19 = smov 0  }
   0xe   :  { %s2488_s20 = smov 0   ;;  %s2490_s21 = smov 0  }
   0xf   :  { %s2492_s22 = smov 0   ;;  %s2494_s23 = smov 0  }
  0x10   :  { %s2496_s24 = smov 0   ;;  %s2498_s25 = smov 0  }
  0x11   :  { %s2500_s26 = smov 0  }
  0x12 LB: > { %3271 = sst [smem:[#allocation15_spill]] %s2385_s13  ;;  %s2546_s27 = sadd.s32 4294967295, %s2437_s26   ;;  %s2437_s26 = sphi %s2500_s26, %s22_s26   ;;  %s2433_s25 = sphi %s2498_s25, %s3349_s25   ;;  %s2429_s24 = sphi %s2496_s24, %s3341_s24   ;;  %s2425_s23 = sphi %s2494_s23, %s3340_s23   ;;  %s2421_s22 = sphi %s2492_s22, %s3348_s22   ;;  %s2417_s21 = sphi %s2490_s21, %s3339_s21   ;;  %s2413_s20 = sphi %s2488_s20, %s3338_s20   ;;  %s2409_s19 = sphi %s2486_s19, %s3337_s19   ;;  %s2405_s18 = sphi %s2484_s18, %s3347_s18   ;;  %s2401_s17 = sphi %s2482_s17, %s3346_s17   ;;  %s2397_s16 = sphi %s2480_s16, %s3345_s16   ;;  %s2393_s15 = sphi %s2478_s15, %s3336_s15   ;;  %s2389_s14 = sphi %s2476_s14, %s3344_s14   ;;  %s2385_s13 = sphi %s2474_s13, %s3343_s13   ;;  %s2381_s12 = sphi %s2472_s12, %s3335_s12  }
  0x13   : > { %3272 = sst [smem:[#allocation16_spill]] %s2393_s15  ;;  %s37_s28 = sadd.s32 1, %s2421_s22 }
  0x14   : > { %3273 = sst [smem:[#allocation17_spill]] %s2397_s16  ;;  %p2549_p0 = scmp.ge.s32.totalorder %s37_s28, 4 }
  0x15   : > { %3274 = sst [smem:[#allocation18_spill]] %s2405_s18  ;;  %p67_p1 = scmp.eq.s32.totalorder %s2437_s26, 0 }
  0x16   : > { %3275 = sst [smem:[#allocation19_spill]] %s2409_s19  ;;  %s3351_s28 = smov (%p2549_p0, %s37_s28), 0 }
  0x17   : > { %3276 = sst [smem:[#allocation20_spill]] %s2413_s20  ;;  %p73_p2 = scmp.eq.s32.totalorder %s2546_s27, 0 }
  0x18   : > { %3277 = sst [smem:[#allocation21_spill]] %s2417_s21  ;;  %p96_p3 = scmp.ne.s32.totalorder %s2389_s14, %s2385_s13 }
  0x19   : > { %3278 = sst [smem:[#allocation22_spill]] %s2425_s23  ;;  %p102_p4 = scmp.ne.s32.totalorder %s2385_s13, %s2381_s12 }
  0x1a   : > { %3279 = sst [smem:[#allocation23_spill]] %s2429_s24  ;;  %p2569_p5 = por %p96_p3, %p67_p1 }
  0x1b   : > { %3280 = sst [smem:[#allocation24_spill]] %s2433_s25  ;;  %p1980_p6 = scmp.lt.s32.totalorder %s2437_s26, 128 }
  0x1c   : > { %3281 = sst [smem:[#allocation25_spill]] %s2546_s27  ;;  %p2576_p7 = por %p102_p4, %p73_p2 }
  0x1d   : > { %s1736_s9 = sshll.u32 %s2429_s24, 5  ;;  %s3249_s10 = sshll.u32 %s2433_s25, 7 }
  0x1e   : > { %s3284_s8 = scalar_select %p2576_p7, 1, 0 }
  0x1f   : > { %s211_s11 = sand.u32 1, %s2437_s26   ;;  %s213_s5 = sand.u32 1, %s2389_s14  }
  0x20   : > { %3285 = sst [smem:[#allocation26_spill]] %s3284_s8  ;;  %s1739_s6 = sshll.u32 %s213_s5, 6 }
  0x21   : > { %s1740_s4 = sshll.u32 %s2421_s22, 3  ;;  %s215_s3 = scalar_lea.vmem [#allocation8], %s1739_s6 }
  0x22   : > { %s221_s12 = sadd.s32 %s1740_s4, %s1736_s9  ;;  %s226_s21 = sshll.u32 %s215_s3, 4  ;;  %s227_s21 = int_to_ptr.vmem [resolvable:$true] %s226_s21 }
  0x23   : > { %s223_s30 = sadd.s32 %s3249_s10, %s221_s12  ;;  %s3286_s1 = sld [smem:[#allocation34_spill]] }
  0x24   : > { %s1743_s20 = sshll.u32 %s223_s30, 7  ;;  %p2596_p8 = pnand %p1980_p6, %p2569_p5 }
  0x25   : > { %s3288_s2 = sld [smem:[#allocation35_spill]]  ;;  %s240_s3 = scalar_lea.vmem [#allocation10], %s1739_s6 }
  0x26   : > { %s251_s30 = sshll.u32 %s240_s3, 4  ;;  %s2605_s12 = scalar_lea.sflag [#allocation9], %s211_s11  ;;  %s2618_s30 = int_to_ptr.vmem [resolvable:$true] %s251_s30 }
  0x27   : > { %p3244_p9 = pneg %p2596_p8  ;;  %s2210_s18 = scalar_lea.vmem %s227_s21, 1024 }
  0x28   : > { %p2211_p10 = scmp.ne.s32.totalorder %s227_s21, %s2210_s18  ;;  %s2439_s19 = smov [#allocation8]  }
  0x29   : > { %s225_s13 = scalar_lea.hbm %s3286_s1, %s1743_s20  ;;  %s2215_s7 = sshll.u32 %s2439_s19, 4  ;;  %s2216_s7 = int_to_ptr.vmem [resolvable:$false] %s2215_s7 }
  0x2a   : > { %p2213_p11 = pnand %p2211_p10, %p3244_p9  ;;  %s2217_s0 = scalar_lea.vmem %s2216_s7, 2048 }
  0x2b   : > { %s2603_s4 = scalar_lea.hbm %s3288_s2, %s1743_s20  ;;  %p2218_p13 = scmp.lt.s32.totalorder %s227_s21, %s2216_s7 }
  0x2c   : > { %p2214_p12 = pneg %p2213_p11  ;;  %p2219_p3 = scmp.lt.s32.totalorder %s2217_s0, %s2210_s18 }
  0x2e   : > { %p2220_p4 = por %p2219_p3, %p2218_p13 }
  0x30   : > { %p2221_p5 = pnand %p2220_p4, %p2214_p12 }
  0x32   : > { %2224 = shalt.err (!%p2221_p5)
}
  0x33   : > { %s3245_s20 = smov 128   ;;  %s3247_s6 = smov 8  }
  0x34   : > { %1972 = dma.hbm_to_vmem [thread:$0]  (!%p2596_p8), %s225_s13, 1024, %s227_s21, %s2605_s12, %s3245_s20, %s3245_s20, %s3247_s6  }
  0x35   : > { %p1749_p10 = scmp.ge.s32.totalorder %s2437_s26, 1  ;;  %p259_p11 = scmp.lt.s32.totalorder %s2437_s26, 129 }
  0x36   : > { %s1731_s5 = sadd.s32 4294967294, %s2437_s26   ;;  %s40_s3 = sadd.s32 1, %s2425_s23 }
  0x37   : > { %p2622_p12 = pnand %p1749_p10, %p259_p11  ;;  %s3353_s3 = smov (!%p2549_p0, %s40_s3), %s2425_s23 }
  0x38   : > { %p66_p13 = scmp.ne.s32.totalorder %s2401_s17, %s2397_s16  ;;  %p42_p3 = scmp.ge.s32.totalorder %s3353_s3, 4 }
  0x39   : > { %p72_p4 = scmp.ne.s32.totalorder %s2397_s16, %s2393_s15  ;;  %p160_p10 = scmp.eq.s32.totalorder %s2546_s27, 127 }
  0x3a   : > { %p2638_p5 = por %p67_p1, %p66_p13  ;;  %s3355_s3 = smov (%p42_p3, %s3353_s3), 0 }
  0x3b   : > { %3291 = sst [smem:[#allocation27_spill]] %s3355_s3  ;;  %s3292_s29 = sadd.s32 1, %s2429_s24 }
  0x3c   : > { %s3357_s29 = smov (!%p42_p3, %s3292_s29), %s2429_s24  ;;  %s55_s18 = ssub.s32 %s2425_s23, %s3355_s3 }
  0x3d   : > { %p2655_p0 = por %p73_p2, %p72_p4  ;;  %p46_p1 = scmp.ge.s32.totalorder %s3357_s29, 4 }
  0x3e   : > { %p2659_p11 = por %p160_p10, %p66_p13  ;;  %p166_p9 = scmp.eq.s32.totalorder %s1731_s5, 127 }
  0x3f   : > { %s3293_s19 = scalar_select %p2655_p0, 1, 0 }
  0x40   : > { %s3295_s7 = scalar_select %p2659_p11, 1, 0 }
  0x41   : > { %3294 = sst [smem:[#allocation28_spill]] %s3293_s19  ;;  %s3256_s0 = sand.u32 1, %s2401_s17  }
  0x42   : > { %3296 = sst [smem:[#allocation29_spill]] %s3295_s7  ;;  %s3359_s29 = smov (%p46_p1, %s3357_s29), 0 }
  0x43   : > { %3297 = sst [smem:[#allocation30_spill]] %s3359_s29  ;;  %s3298_s20 = sadd.s32 1, %s2433_s25 }
  0x44   : > { %s3361_s20 = smov (!%p46_p1, %s3298_s20), %s2433_s25  ;;  %s53_s6 = ssub.s32 %s2429_s24, %s3359_s29 }
  0x45   : > { %p2674_p2 = por %p166_p9, %p72_p4  ;;  %p50_p3 = scmp.ge.s32.totalorder %s3361_s20, 2 }
  0x46   : > { %s1734_s10 = sshll.u32 %s3256_s0, 6  ;;  %s1735_s5 = sshll.u32 %s2425_s23, 3 }
  0x47   : > { %s3299_s13 = scalar_select %p2674_p2, 1, 0 }
  0x48   : > { %s3363_s20 = smov (%p50_p3, %s3361_s20), 0  ;;  %s196_s1 = sadd.s32 %s1736_s9, %s1735_s5 }
  0x49   : > { %3300 = sst [smem:[#allocation31_spill]] %s3299_s13  ;;  %s52_s2 = ssub.s32 %s2433_s25, %s3363_s20 }
  0x4a   : > { %3301 = sst [smem:[#allocation32_spill]] %s3363_s20  ;;  %s3302_s29 = sshll.u32 %s2433_s25, 7 }
  0x4b   : > { %s198_s3 = sadd.s32 %s3302_s29, %s196_s1  ;;  %s54_s13 = sor.u32 %s53_s6, %s52_s2 }
  0x4c   : > { %s1738_s15 = sshll.u32 %s198_s3, 7  ;;  %s56_s7 = sor.u32 %s55_s18, %s54_s13 }
  0x4d   : > { %s3303_s0 = ssub.s32 %s2421_s22, %s3351_s28  ;;  %p57_p9 = scmp.eq.s32.totalorder %s56_s7, 0 }
  0x4e   : > { %s86_s27 = sor.u32 %s3303_s0, %s54_s13  ;;  %s3304_s24 = sld [smem:[#allocation33_spill]] }
  0x4f   : > { %p87_p13 = scmp.eq.s32.totalorder %s86_s27, 0  ;;  %s190_s9 = scalar_lea.vmem [#allocation5], %s1734_s10 }
  0x50   : > { %s201_s5 = sshll.u32 %s190_s9, 4  ;;  %s3305_s20 = sadd.s32 1, %s2401_s17  ;;  %s2707_s5 = int_to_ptr.vmem [resolvable:$true] %s201_s5 }
  0x51   : > { %s2700_s25 = scalar_select %p57_p9, %s2401_s17, %s3305_s20  }
  0x52   : > { %s3306_s1 = sadd.s32 1, %s2389_s14  ;;  %p2713_p4 = pnand %p1980_p6, %p2638_p5 }
  0x53   : > { %s2705_s29 = scalar_select %p87_p13, %s2389_s14, %s3306_s1  }
  0x54   : > { %s2695_s16 = scalar_lea.hbm %s3304_s24, %s1738_s15  ;;  %s2238_s23 = scalar_lea.vmem %s2618_s30, 1024 }
  0x55   : > { %p2239_p10 = scmp.ne.s32.totalorder %s2618_s30, %s2238_s23  ;;  %p3308_p1 = pneg %p2596_p8 }
  0x56   : > { %s2442_s15 = smov [#allocation10]  }
  0x57   : > { %p2241_p3 = pnand %p2239_p10, %p3308_p1  ;;  %s2243_s24 = sshll.u32 %s2442_s15, 4  ;;  %s2244_s24 = int_to_ptr.vmem [resolvable:$false] %s2243_s24 }
  0x58   : > { %s2245_s27 = scalar_lea.vmem %s2244_s24, 2048  ;;  %p2246_p9 = scmp.lt.s32.totalorder %s2618_s30, %s2244_s24 }
  0x59   : > { %p2242_p2 = pneg %p2241_p3  ;;  %p2247_p13 = scmp.lt.s32.totalorder %s2245_s27, %s2238_s23 }
  0x5b   : > { %p2248_p11 = por %p2247_p13, %p2246_p9 }
  0x5d   : > { %p2249_p7 = pnand %p2248_p11, %p2242_p2 }
  0x5f   : > { %2252 = shalt.err (!%p2249_p7)
}
  0x60   : > { %s3309_s10 = smov 8   ;;  %s3310_s20 = smov 128  }
  0x61   : > { %1975 = dma.hbm_to_vmem [thread:$0]  (!%p2596_p8), %s2603_s4, 1024, %s2618_s30, %s2605_s12, %s3310_s20, %s3310_s20, %s3309_s10  }
  0x62   : > { %s3311_s6 = sand.u32 1, %s2401_s17   ;;  %p2255_p6 = pneg %p2713_p4 }
  0x63   : > { %s187_s3 = scalar_lea.sflag [#allocation6], %s3311_s6  ;;  %s2266_s13 = scalar_lea.vmem %s2707_s5, 1024 }
  0x64   : > { %p2267_p7 = scmp.ne.s32.totalorder %s2707_s5, %s2266_s13  ;;  %s2443_s8 = smov [#allocation5]  }
  0x65   : > { %s2271_s21 = sshll.u32 %s2443_s8, 4  ;;  %s2272_s21 = int_to_ptr.vmem [resolvable:$false] %s2271_s21 }
  0x66   : > { %p2269_p5 = pnand %p2267_p7, %p2255_p6  ;;  %s2273_s18 = scalar_lea.vmem %s2272_s21, 2048 }
  0x67   : > { %p2274_p2 = scmp.lt.s32.totalorder %s2707_s5, %s2272_s21  ;;  %p2275_p10 = scmp.lt.s32.totalorder %s2273_s18, %s2266_s13 }
  0x68   : > { %p2270_p11 = pneg %p2269_p5 }
  0x69   : > { %p2276_p1 = por %p2275_p10, %p2274_p2 }
  0x6b   : > { %p2277_p3 = pnand %p2276_p1, %p2270_p11 }
  0x6d   : > { %2280 = shalt.err (!%p2277_p3)
}
  0x6e   : > { %1969 = dma.hbm_to_vmem [thread:$0]  (!%p2713_p4), %s2695_s16, 1024, %s2707_s5, %s187_s3, %s3310_s20, %s3310_s20, %s3309_s10  }
  0x6f   : > { %263 = sbr.rel (%p2622_p12) target bundleno = 1854 (0x73e), region = 32  ;;  %s3312_s4 = sld [smem:[#allocation17_spill]] (!%p2622_p12) }
  0x75   : > { %s2748_s12 = sand.u32 1, %s3312_s4  }
  0x76   : > { %s1750_s19 = sshll.u32 %s2748_s12, 6  ;;  %s266_s7 = scalar_lea.sflag [#allocation6], %s2748_s12 }
  0x77   : > { %s2752_s0 = scalar_lea.vmem [#allocation5], %s1750_s19 }
  0x78   : > { %2368 = dma.done.wait (%p2655_p0), %s266_s7, 1024  }
  0x79   : > { %2370 = vsyncadd (%p2655_p0), %s266_s7, 4294966272  ;;  %s3314_s9 = sld [smem:[#allocation25_spill]] }
  0x7a   : > { %s3315_s16 = sld [smem:[#allocation15_spill]] }
  0x7b   : > { %s3316_s5 = sld [smem:[#allocation26_spill]] }
  0x7f   : > { %s274_s11 = sand.u32 1, %s3314_s9  }
  0x80   : > { %s276_s1 = sand.u32 1, %s3315_s16   ;;  %s275_s23 = scalar_lea.sflag [#allocation9], %s274_s11 }
  0x81   : > { %s1751_s2 = sshll.u32 %s276_s1, 6  ;;  %p3317_p8 = scmp.ne.s32.totalorder %s3316_s5, 0 }
  0x82   : > { %s2760_s15 = scalar_lea.vmem [#allocation8], %s1751_s2 }
  0x83   : > { %2372 = dma.done.wait (%p3317_p8), %s275_s23, 2048  }
  0x84   : > { %2374 = vsyncadd (%p3317_p8), %s275_s23, 4294965248  ;;  %s2766_s24 = scalar_lea.vmem [#allocation10], %s1751_s2  ;;  %s2768_s27 = scalar_lea.vmem [#allocation11], %s1750_s19 }
  0x85   : > { %s3318_s10 = sld [smem:[#allocation18_spill]] }
  0x8b   : > { %p1754_p12 = scmp.ne.s32.totalorder %s3318_s10, 0 }
  0x8d   : > { %327 = sbr.rel (%p1754_p12) target bundleno = 159 (0x9f), region = 48 }
  0x92   : > { %vm328_vm0 = vcmask 7168   ;;  %v2444_v0 = vmov -inf   ;;  %v2445_v1 = vmov 0.0  }
  0x93   : > { %329 = vst.msk [vmem:[#allocation2] sm:$0xff] %vm328_vm0, %v2444_v0  ;;  %330 = vst.msk [vmem:[#allocation2 + $0x8] sm:$0xff] %vm328_vm0, %v2444_v0 }
  0x94   : > { %331 = vst.msk [vmem:[#allocation2 + $0x10] sm:$0xff] %vm328_vm0, %v2444_v0  ;;  %332 = vst.msk [vmem:[#allocation2 + $0x18] sm:$0xff] %vm328_vm0, %v2444_v0 }
  0x95   : > { %333 = vst.msk [vmem:[#allocation2 + $0x20] sm:$0xff] %vm328_vm0, %v2444_v0  ;;  %334 = vst.msk [vmem:[#allocation2 + $0x28] sm:$0xff] %vm328_vm0, %v2444_v0 }
  0x96   : > { %335 = vst.msk [vmem:[#allocation2 + $0x30] sm:$0xff] %vm328_vm0, %v2444_v0  ;;  %336 = vst.msk [vmem:[#allocation2 + $0x38] sm:$0xff] %vm328_vm0, %v2444_v0 }
  0x97   : > { %337 = vst.msk [vmem:[#allocation3] sm:$0xff] %vm328_vm0, %v2445_v1  ;;  %338 = vst.msk [vmem:[#allocation3 + $0x8] sm:$0xff] %vm328_vm0, %v2445_v1 }
  0x98   : > { %339 = vst.msk [vmem:[#allocation3 + $0x10] sm:$0xff] %vm328_vm0, %v2445_v1  ;;  %340 = vst.msk [vmem:[#allocation3 + $0x18] sm:$0xff] %vm328_vm0, %v2445_v1 }
  0x99   : > { %341 = vst.msk [vmem:[#allocation3 + $0x20] sm:$0xff] %vm328_vm0, %v2445_v1  ;;  %342 = vst.msk [vmem:[#allocation3 + $0x28] sm:$0xff] %vm328_vm0, %v2445_v1 }
  0x9a   : > { %343 = vst.msk [vmem:[#allocation3 + $0x30] sm:$0xff] %vm328_vm0, %v2445_v1  ;;  %344 = vst.msk [vmem:[#allocation3 + $0x38] sm:$0xff] %vm328_vm0, %v2445_v1 }
  0x9b   : > { %345 = vst [vmem:[#allocation4 + $0x30] sm:$0xff] %v2445_v1  ;;  %346 = vst [vmem:[#allocation4] sm:$0xff] %v2445_v1 }
  0x9c   : > { %347 = vst [vmem:[#allocation4 + $0x18] sm:$0xff] %v2445_v1  ;;  %348 = vst [vmem:[#allocation4 + $0x10] sm:$0xff] %v2445_v1 }
  0x9d   : > { %349 = vst [vmem:[#allocation4 + $0x8] sm:$0xff] %v2445_v1  ;;  %350 = vst [vmem:[#allocation4 + $0x20] sm:$0xff] %v2445_v1 }
  0x9e   : > { %351 = vst [vmem:[#allocation4 + $0x28] sm:$0xff] %v2445_v1  ;;  %352 = vst [vmem:[#allocation4 + $0x38] sm:$0xff] %v2445_v1 }
  0x9f PF: > { %s3319_s20 = sld [smem:[#allocation19_spill]] }
  0xa0   : > { %s3320_s6 = sld [smem:[#allocation18_spill]] }
  0xa5   : > { %s2788_s3 = sshll.u32 %s3319_s20, 6 }
  0xa6   : > { %s2791_s13 = sshll.u32 %s3320_s6, 6  ;;  %s354_s8 = sadd.s32 63, %s2788_s3 }
  0xa7   : > { %s356_s21 = sadd.s32 63, %s2791_s13  ;;  %p2796_p0 = scmp.le.s32.totalorder %s2791_s13, %s354_s8 }
  0xa8   : > { %p2801_p4 = scmp.gt.s32.totalorder %s356_s21, %s2788_s3 }
  0xaa   : > { %p360_p9 = pnand %p2801_p4, %p2796_p0  ;;  %364 = sbr.rel (%p2801_p4) target bundleno = 912 (0x390), region = 52 }
  0xaf   : > { %v388_v2 = vld [vmem:[%s2760_s15 + $0x38] sm:$0xff]  ;;  %v387_v3 = vld [vmem:[%s2760_s15 + $0x30] sm:$0xff]  ;;  %v365_v4 = vld [vmem:[%s2752_s0] sm:$0xff]  ;;  %vm502_vm1 = vcmask 523264   ;;  %v2446_v41 = vmov 0   ;;  %vm671_vm2 = vcmask 7168  }
  0xb0   : > { %1846 = vmatprep.subr.mxu0 %v388_v2  ;;  %v373_v5 = vmul.f32 0.088388346, %v365_v4  ;;  %v386_v6 = vld [vmem:[%s2760_s15 + $0x28] sm:$0xff]  ;;  %v385_v7 = vld [vmem:[%s2760_s15 + $0x20] sm:$0xff]  ;;  %v384_v8 = vld [vmem:[%s2760_s15 + $0x18] sm:$0xff]  ;;  %2111 = vset.pattern.permute.xlu0 %v2446_v41 }
  0xb1   : > { %1847 = vmatpush3.xpose.msra.mxu0 %v388_v2  ;;  %v383_v9 = vld [vmem:[%s2760_s15 + $0x10] sm:$0xff]  ;;  %v382_v10 = vld [vmem:[%s2760_s15 + $0x8] sm:$0xff]  ;;  %v381_v11 = vld [vmem:[%s2760_s15] sm:$0xff]  ;;  %2112 = vset.pattern.permute.xlu1 %v2446_v41 }
  0xb2   : > { %1848 = vmatprep.subr.mxu0 %v387_v3  ;;  %1862 = vmatprep.mubr.f32.mxu0 %v373_v5  ;;  %v366_v12 = vld [vmem:[%s2752_s0 + $0x8] sm:$0xff]  ;;  %v367_v13 = vld [vmem:[%s2752_s0 + $0x10] sm:$0xff]  ;;  %v368_v16 = vld [vmem:[%s2752_s0 + $0x18] sm:$0xff] }
  0xb3   : > { %v374_v14 = vmul.f32 0.088388346, %v366_v12  ;;  %v375_v15 = vmul.f32 0.088388346, %v367_v13  ;;  %v369_v17 = vld [vmem:[%s2752_s0 + $0x20] sm:$0xff]  ;;  %v370_v20 = vld [vmem:[%s2752_s0 + $0x28] sm:$0xff] }
  0xb4   : > { %v376_v18 = vmul.f32 0.088388346, %v368_v16  ;;  %v377_v19 = vmul.f32 0.088388346, %v369_v17  ;;  %v371_v21 = vld [vmem:[%s2752_s0 + $0x30] sm:$0xff]  ;;  %v372_v24 = vld [vmem:[%s2752_s0 + $0x38] sm:$0xff] }
  0xb5   : > { %1849 = vmatpush3.xpose.msra.mxu0 %v387_v3  ;;  %v378_v22 = vmul.f32 0.088388346, %v370_v20  ;;  %v379_v23 = vmul.f32 0.088388346, %v371_v21  ;;  %v380_v25 = vmul.f32 0.088388346, %v372_v24 }
  0xb6   : > { %1850 = vmatprep.subr.mxu0 %v386_v6  ;;  %v494_v43 = vld [vmem:[#allocation2] sm:$0xff]  ;;  %v495_v46 = vld [vmem:[#allocation2 + $0x8] sm:$0xff]  ;;  %v2859_v47 = vld [vmem:[#allocation2 + $0x10] sm:$0xff] }
  0xb7   : > { %v687_v54 = vld [vmem:[%s2766_s24 + $0x38] sm:$0xff]  ;;  %v2866_v56 = vld [vmem:[#allocation2 + $0x20] sm:$0xff]  ;;  %v686_v57 = vld [vmem:[%s2766_s24 + $0x30] sm:$0xff] }
  0xb8   : > { %v497_v55 = vld [vmem:[#allocation2 + $0x18] sm:$0xff]  ;;  %1874 = vmatprep.subr.mxu1 %v687_v54  ;;  %v685_v62 = vld [vmem:[%s2766_s24 + $0x28] sm:$0xff]  ;;  %v2874_v0 = vld [vmem:[#allocation2 + $0x30] sm:$0xff] }
  0xb9   : > { %1851 = vmatpush3.xpose.msra.mxu0 %v386_v6  ;;  %1875 = vmatpush3.msra.mxu1 %v687_v54  ;;  %v499_v63 = vld [vmem:[#allocation2 + $0x28] sm:$0xff]  ;;  %v684_v2 = vld [vmem:[%s2766_s24 + $0x20] sm:$0xff]  ;;  %v682_v13 = vld [vmem:[%s2766_s24 + $0x10] sm:$0xff] }
  0xba   : > { %1852 = vmatprep.subr.mxu0 %v385_v7  ;;  %1876 = vmatprep.subr.mxu1 %v686_v57  ;;  %v680_v21 = vld [vmem:[%s2766_s24] sm:$0xff] }
  0xbb   : > { %1877 = vmatpush3.msra.mxu1 %v686_v57 }
  0xbc   : > { %1878 = vmatprep.subr.mxu1 %v685_v62 }
  0xbd   : > { %1853 = vmatpush3.xpose.msra.mxu0 %v385_v7  ;;  %1879 = vmatpush3.msra.mxu1 %v685_v62 }
  0xbe   : > { %1854 = vmatprep.subr.mxu0 %v384_v8  ;;  %1880 = vmatprep.subr.mxu1 %v684_v2 }
  0xbf   : > { %1881 = vmatpush3.msra.mxu1 %v684_v2 }
  0xc1   : > { %1855 = vmatpush3.xpose.msra.mxu0 %v384_v8 }
  0xc2   : > { %1856 = vmatprep.subr.mxu0 %v383_v9 }
  0xc5   : > { %1857 = vmatpush3.xpose.msra.mxu0 %v383_v9  ;;  %v683_v9 = vld [vmem:[%s2766_s24 + $0x18] sm:$0xff] }
  0xc6   : > { %1858 = vmatprep.subr.mxu0 %v382_v10  ;;  %1882 = vmatprep.subr.mxu1 %v683_v9 }
  0xc7   : > { %1883 = vmatpush3.msra.mxu1 %v683_v9 }
  0xc8   : > { %1884 = vmatprep.subr.mxu1 %v682_v13 }
  0xc9   : > { %1859 = vmatpush3.xpose.msra.mxu0 %v382_v10  ;;  %v2883_v10 = vld [vmem:[#allocation2 + $0x38] sm:$0xff]  ;;  %1885 = vmatpush3.msra.mxu1 %v682_v13 }
  0xca   : > { %1860 = vmatprep.subr.mxu0 %v381_v11 }
  0xcd   : > { %1861 = vmatpush3.xpose.msra.mxu0 %v381_v11 }
  0xd0   : > { %1863 = vmatmul.mubr.f32.vlgmr.msra.gmra.mxu0 %v374_v14 }
  0xd1   : > { %1865 = vmatprep.mubr.f32.mxu0 %v375_v15 }
  0xd4   : > { %1866 = vmatmul.mubr.f32.gmra.mxu0 %v376_v18 }
  0xd5   : > { %1868 = vmatprep.mubr.f32.mxu0 %v377_v19  ;;  %v681_v19 = vld [vmem:[%s2766_s24 + $0x8] sm:$0xff] }
  0xd6   : > { %1886 = vmatprep.subr.mxu1 %v681_v19 }
  0xd7   : > { %1887 = vmatpush3.msra.mxu1 %v681_v19 }
  0xd8   : > { %1869 = vmatmul.mubr.f32.gmra.mxu0 %v378_v22  ;;  %1888 = vmatprep.subr.mxu1 %v680_v21 }
  0xd9   : > { %1871 = vmatprep.mubr.f32.mxu0 %v379_v23  ;;  %1889 = vmatpush3.msra.mxu1 %v680_v21 }
  0xdc   : > { %1872 = vmatmul.mubr.f32.gmra.mxu0 %v380_v25 }
 0x190   : > { %v2827_v26 = vpop.f32.mrf.mxu0 }
 0x191   : > { %v506_v31 = vsel %vm502_vm1, %v2827_v26, -inf }
 0x192   : > { %v2829_v27 = vpop.f32.mrf.mxu0 }
 0x193   : > { %v503_v28 = vsel %vm502_vm1, %v2829_v27, -inf }
 0x194   : > { %504 = vmax.xlane.f32.xlu0 %v503_v28  ;;  %v2833_v29 = vpop.f32.mrf.mxu0 }
 0x195   : > { %v512_v35 = vsel %vm502_vm1, %v2833_v29, -inf }
 0x196   : > { %v2835_v30 = vpop.f32.mrf.mxu0 }
 0x197   : > { %v509_v32 = vsel %vm502_vm1, %v2835_v30, -inf }
 0x198   : > { %507 = vmax.xlane.f32.xlu0 %v506_v31  ;;  %510 = vmax.xlane.f32.xlu1 %v509_v32  ;;  %v2841_v33 = vpop.f32.mrf.mxu0 }
 0x199   : > { %v518_v38 = vsel %vm502_vm1, %v2841_v33, -inf }
 0x19a   : > { %v2843_v34 = vpop.f32.mrf.mxu0 }
 0x19b   : > { %v515_v36 = vsel %vm502_vm1, %v2843_v34, -inf }
 0x19c   : > { %513 = vmax.xlane.f32.xlu1 %v512_v35  ;;  %516 = vmax.xlane.f32.xlu0 %v515_v36  ;;  %v2849_v37 = vpop.f32.mrf.mxu0 }
 0x19d   : > { %v524_v42 = vsel %vm502_vm1, %v2849_v37, -inf }
 0x19e   : > { %v2853_v39 = vpop.f32.mrf.mxu0 }
 0x19f   : > { %v521_v40 = vsel %vm502_vm1, %v2853_v39, -inf }
 0x1a0   : > { %519 = vmax.xlane.f32.xlu1 %v518_v38  ;;  %522 = vmax.xlane.f32.xlu0 %v521_v40 }
 0x1a4   : > { %525 = vmax.xlane.f32.xlu1 %v524_v42 }
 0x21d   : > { %v505_v44 = vpop.xlane.xlu0 %504 }
 0x21e   : > { %v527_v45 = vmax.f32 %v494_v43, %v505_v44 }
 0x220   : > { %v535_v48 = vsub.f32 %v494_v43, %v527_v45  ;;  %889 = vst.msk [vmem:[#allocation2] sm:$0xff] %vm671_vm2, %v527_v45  ;;  %561 = vperm.xlu0 %2111, %v527_v45  }
 0x221   : > { %v508_v49 = vpop.xlane.xlu0 %507  ;;  %v511_v50 = vpop.xlane.xlu1 %510 }
 0x222   : > { %v543_v51 = vmul.f32 1.442695, %v535_v48  ;;  %v528_v52 = vmax.f32 %v495_v46, %v508_v49  ;;  %v2863_v53 = vmax.f32 %v2859_v47, %v511_v50 }
 0x224   : > { %2113 = vpow2.f32 %v543_v51  ;;  %890 = vst.msk [vmem:[#allocation2 + $0x8] sm:$0xff] %vm671_vm2, %v528_v52  ;;  %891 = vst.msk [vmem:[#allocation2 + $0x10] sm:$0xff] %vm671_vm2, %v2863_v53  ;;  %566 = vperm.xlu1 %2112, %v528_v52   ;;  %v536_v5 = vsub.f32 %v495_v46, %v528_v52  ;;  %v537_v16 = vsub.f32 %v2859_v47, %v2863_v53 }
 0x225   : > { %v514_v58 = vpop.xlane.xlu1 %513  ;;  %v517_v59 = vpop.xlane.xlu0 %516 }
 0x226   : > { %v530_v60 = vmax.f32 %v497_v55, %v514_v58  ;;  %v531_v61 = vmax.f32 %v2866_v56, %v517_v59  ;;  %v545_v15 = vmul.f32 1.442695, %v536_v5  ;;  %v547_v23 = vmul.f32 1.442695, %v537_v16 }
 0x228   : > { %v538_v1 = vsub.f32 %v497_v55, %v530_v60  ;;  %892 = vst.msk [vmem:[#allocation2 + $0x18] sm:$0xff] %vm671_vm2, %v530_v60  ;;  %576 = vperm.xlu1 %2112, %v530_v60   ;;  %893 = vst.msk [vmem:[#allocation2 + $0x20] sm:$0xff] %vm671_vm2, %v531_v61  ;;  %v539_v24 = vsub.f32 %v2866_v56, %v531_v61 }
 0x229   : > { %v520_v3 = vpop.xlane.xlu1 %519  ;;  %v523_v4 = vpop.xlane.xlu0 %522 }
 0x22a   : > { %v549_v6 = vmul.f32 1.442695, %v538_v1  ;;  %v532_v7 = vmax.f32 %v499_v63, %v520_v3  ;;  %v2880_v8 = vmax.f32 %v2874_v0, %v523_v4  ;;  %v551_v25 = vmul.f32 1.442695, %v539_v24 }
 0x22c   : > { %2115 = vpow2.f32 %v549_v6  ;;  %v540_v11 = vsub.f32 %v499_v63, %v532_v7  ;;  %894 = vst.msk [vmem:[#allocation2 + $0x28] sm:$0xff] %vm671_vm2, %v532_v7  ;;  %571 = vperm.xlu1 %2112, %v2863_v53   ;;  %v541_v12 = vsub.f32 %v2874_v0, %v2880_v8  ;;  %895 = vst.msk [vmem:[#allocation2 + $0x30] sm:$0xff] %vm671_vm2, %v2880_v8 }
 0x22d   : > { %v526_v14 = vpop.xlane.xlu1 %525 }
 0x22e   : > { %v553_v17 = vmul.f32 1.442695, %v540_v11  ;;  %v2895_v18 = vmax.f32 %v2883_v10, %v526_v14 }
 0x230   : > { %2117 = vpow2.f32 %v553_v17  ;;  %586 = vperm.xlu1 %2112, %v532_v7   ;;  %v542_v20 = vsub.f32 %v2883_v10, %v2895_v18  ;;  %896 = vst.msk [vmem:[#allocation2 + $0x38] sm:$0xff] %vm671_vm2, %v2895_v18  ;;  %v555_v7 = vmul.f32 1.442695, %v541_v12  ;;  %v623_v12 = vld [vmem:[#allocation3] sm:$0xff]  ;;  %v624_v10 = vld [vmem:[#allocation3 + $0x8] sm:$0xff] }
 0x231   : > { %v2903_v22 = vpop.eup %2113  ;;  %2119 = vpow2.f32 %v545_v15 }
 0x232   : > { %827 = vperm.xlu0 %2111, %v2903_v22   ;;  %2121 = vpow2.f32 %v547_v23  ;;  %v557_v11 = vmul.f32 1.442695, %v542_v20  ;;  %v631_v19 = vmul.f32 %v2903_v22, %v623_v12 }
 0x233   : > { %2123 = vpow2.f32 %v551_v25  ;;  %v626_v25 = vld [vmem:[#allocation3 + $0x18] sm:$0xff] }
 0x234   : > { %581 = vperm.xlu1 %2112, %v531_v61  }
 0x238   : > { %591 = vperm.xlu1 %2112, %v2880_v8  }
 0x239   : > { %v2908_v28 = vpop.eup %2115 }
 0x23a   : > { %842 = vperm.xlu0 %2111, %v2908_v28  }
 0x23c   : > { %596 = vperm.xlu1 %2112, %v2895_v18  }
 0x23d   : > { %v2912_v31 = vpop.eup %2117 }
 0x23e   : > { %852 = vperm.xlu0 %2111, %v2912_v31   ;;  %v2915_v32 = vpop.eup %2119 }
 0x23f   : > { %v2918_v35 = vpop.eup %2121  ;;  %v632_v20 = vmul.f32 %v2915_v32, %v624_v10 }
 0x240   : > { %832 = vperm.xlu1 %2112, %v2915_v32   ;;  %v2921_v36 = vpop.eup %2123 }
 0x244   : > { %837 = vperm.xlu1 %2112, %v2918_v35  }
 0x248   : > { %847 = vperm.xlu1 %2112, %v2921_v36  }
 0x29b   : > { %v562_v38 = vpop.permute.xlu0 %561 }
 0x29c   : > { %v599_v40 = vsub.f32 %v2829_v27, %v562_v38 }
 0x29e   : > { %v607_v41 = vmul.f32 1.442695, %v599_v40  ;;  %v634_v40 = vmul.f32 %v2908_v28, %v626_v25 }
 0x29f   : > { %v567_v42 = vpop.permute.xlu1 %566 }
 0x2a0   : > { %2125 = vpow2.f32 %v607_v41  ;;  %v600_v43 = vsub.f32 %v2827_v26, %v567_v42  ;;  %v625_v42 = vld [vmem:[#allocation3 + $0x10] sm:$0xff] }
 0x2a1   : > { %v633_v22 = vmul.f32 %v2918_v35, %v625_v42 }
 0x2a2   : > { %v609_v44 = vmul.f32 1.442695, %v600_v43 }
 0x2a3   : > { %v577_v45 = vpop.permute.xlu1 %576 }
 0x2a4   : > { %2127 = vpow2.f32 %v609_v44  ;;  %v602_v46 = vsub.f32 %v2833_v29, %v577_v45  ;;  %v628_v45 = vld [vmem:[#allocation3 + $0x28] sm:$0xff] }
 0x2a5   : > { %v636_v32 = vmul.f32 %v2912_v31, %v628_v45 }
 0x2a6   : > { %v613_v47 = vmul.f32 1.442695, %v602_v46 }
 0x2a7   : > { %v572_v48 = vpop.permute.xlu1 %571 }
 0x2a8   : > { %2129 = vpow2.f32 %v613_v47  ;;  %v601_v49 = vsub.f32 %v2835_v30, %v572_v48  ;;  %v627_v48 = vld [vmem:[#allocation3 + $0x20] sm:$0xff] }
 0x2a9   : > { %v635_v28 = vmul.f32 %v2921_v36, %v627_v48 }
 0x2aa   : > { %v611_v50 = vmul.f32 1.442695, %v601_v49 }
 0x2ab   : > { %v587_v51 = vpop.permute.xlu1 %586 }
 0x2ac   : > { %2131 = vpow2.f32 %v611_v50  ;;  %v604_v27 = vsub.f32 %v2841_v33, %v587_v51  ;;  %v629_v51 = vld [vmem:[#allocation3 + $0x30] sm:$0xff] }
 0x2ad   : > { %v2126_v52 = vpop.eup %2125  ;;  %v828_v16 = vpop.permute.xlu0 %827 }
 0x2ae   : > { %v617_v53 = vmul.f32 1.442695, %v604_v27  ;;  %1890 = vmatprep.mubr.msk.f32.mxu1 %vm502_vm1, %v2126_v52  ;;  %v639_v26 = vsel %vm502_vm1, %v2126_v52, 0.0 }
 0x2af   : > { %v582_v54 = vpop.permute.xlu1 %581  ;;  %640 = vadd.xlane.f32.xlu1 %v639_v26 }
 0x2b0   : > { %2133 = vpow2.f32 %v617_v53  ;;  %v603_v29 = vsub.f32 %v2843_v34, %v582_v54  ;;  %v630_v53 = vld [vmem:[#allocation3 + $0x38] sm:$0xff] }
 0x2b1   : > { %v2128_v55 = vpop.eup %2127 }
 0x2b2   : > { %v615_v56 = vmul.f32 1.442695, %v603_v29  ;;  %1891 = vmatmul.mubr.msk.f32.vlgmr.msra.gmra.mxu1 %vm502_vm1, %v2128_v55  ;;  %v642_v30 = vsel %vm502_vm1, %v2128_v55, 0.0  ;;  %v818_v55 = vld [vmem:[#allocation4] sm:$0xff] }
 0x2b3   : > { %643 = vadd.xlane.f32.xlu0 %v642_v30  ;;  %v592_v57 = vpop.permute.xlu1 %591 }
 0x2b4   : > { %2135 = vpow2.f32 %v615_v56  ;;  %v605_v33 = vsub.f32 %v2853_v39, %v592_v57  ;;  %v817_v56 = vld [vmem:[#allocation4 + $0x30] sm:$0xff] }
 0x2b5   : > { %v2130_v58 = vpop.eup %2129  ;;  %v843_v0 = vpop.permute.xlu0 %842  ;;  %v865_v57 = vmul.f32 %v828_v16, %v817_v56 }
 0x2b6   : > { %v619_v59 = vmul.f32 1.442695, %v605_v33  ;;  %v648_v60 = vsel %vm502_vm1, %v2130_v58, 0.0 }
 0x2b7   : > { %v597_v61 = vpop.permute.xlu1 %596  ;;  %649 = vadd.xlane.f32.xlu1 %v648_v60  ;;  %v820_v60 = vld [vmem:[#allocation4 + $0x10] sm:$0xff] }
 0x2b8   : > { %2137 = vpow2.f32 %v619_v59  ;;  %v606_v34 = vsub.f32 %v2849_v37, %v597_v61  ;;  %v819_v61 = vld [vmem:[#allocation4 + $0x18] sm:$0xff] }
 0x2b9   : > { %v2132_v62 = vpop.eup %2131  ;;  %v853_v21 = vpop.permute.xlu0 %852 }
 0x2ba   : > { %v621_v63 = vmul.f32 1.442695, %v606_v34  ;;  %1893 = vmatprep.mubr.msk.f32.mxu1 %vm502_vm1, %v2132_v62  ;;  %v645_v1 = vsel %vm502_vm1, %v2132_v62, 0.0  ;;  %v868_v34 = vmul.f32 %v843_v0, %v820_v60 }
 0x2bb   : > { %646 = vadd.xlane.f32.xlu0 %v645_v1  ;;  %1894 = vmatmul.mubr.msk.f32.gmra.mxu1 %vm502_vm1, %v2130_v58  ;;  %v833_v15 = vpop.permute.xlu1 %832 }
 0x2bc   : > { %2139 = vpow2.f32 %v621_v63  ;;  %v866_v30 = vmul.f32 %v833_v15, %v818_v55  ;;  %v823_v15 = vld [vmem:[#allocation4 + $0x28] sm:$0xff] }
 0x2bd   : > { %v2134_v39 = vpop.eup %2133  ;;  %2141 = vpow2.f32 %v555_v7 }
 0x2be   : > { %v654_v2 = vsel %vm502_vm1, %v2134_v39, 0.0  ;;  %2143 = vpow2.f32 %v557_v11  ;;  %v824_v11 = vld [vmem:[#allocation4 + $0x38] sm:$0xff] }
 0x2bf   : > { %655 = vadd.xlane.f32.xlu1 %v654_v2  ;;  %v838_v17 = vpop.permute.xlu1 %837 }
 0x2c0   : > { %v867_v63 = vmul.f32 %v838_v17, %v819_v61 }
 0x2c1   : > { %v2136_v3 = vpop.eup %2135 }
 0x2c2   : > { %1896 = vmatprep.mubr.msk.f32.mxu1 %vm502_vm1, %v2136_v3  ;;  %v651_v4 = vsel %vm502_vm1, %v2136_v3, 0.0  ;;  %v822_v3 = vld [vmem:[#allocation4 + $0x20] sm:$0xff] }
 0x2c3   : > { %652 = vadd.xlane.f32.xlu0 %v651_v4  ;;  %1897 = vmatmul.mubr.msk.f32.gmra.mxu1 %vm502_vm1, %v2134_v39  ;;  %v2954_v8 = vpop.permute.xlu1 %847  ;;  %v821_v4 = vld [vmem:[#allocation4 + $0x8] sm:$0xff] }
 0x2c5   : > { %v2138_v37 = vpop.eup %2137 }
 0x2c6   : > { %1899 = vmatprep.mubr.msk.f32.mxu1 %vm502_vm1, %v2138_v37  ;;  %v657_v5 = vsel %vm502_vm1, %v2138_v37, 0.0  ;;  %v870_v37 = vmul.f32 %v853_v21, %v822_v3 }
 0x2c7   : > { %658 = vadd.xlane.f32.xlu0 %v657_v5 }
 0x2c9   : > { %v2140_v6 = vpop.eup %2139 }
 0x2ca   : > { %1900 = vmatmul.mubr.msk.f32.gmra.mxu1 %vm502_vm1, %v2140_v6  ;;  %v660_v9 = vsel %vm502_vm1, %v2140_v6, 0.0  ;;  %v2142_v13 = vpop.eup %2141  ;;  %v869_v6 = vmul.f32 %v2954_v8, %v821_v4 }
 0x2cb   : > { %661 = vadd.xlane.f32.xlu1 %v660_v9  ;;  %v2144_v14 = vpop.eup %2143  ;;  %v637_v35 = vmul.f32 %v2142_v13, %v629_v51 }
 0x2cc   : > { %v638_v54 = vmul.f32 %v2144_v14, %v630_v53 }
 0x2dc   : > { %857 = vperm.xlu1 %2112, %v2142_v13  }
 0x2dd   : > { %862 = vperm.xlu0 %2111, %v2144_v14  }
 0x338   : > { %v641_v23 = vpop.xlane.xlu1 %640 }
 0x339   : > { %v663_v18 = vadd.f32 %v641_v23, %v631_v19 }
 0x33b   : > { %672 = vst.msk [vmem:[#allocation3] sm:$0xff] %vm671_vm2, %v663_v18 }
 0x33c   : > { %v644_v24 = vpop.xlane.xlu0 %643 }
 0x33d   : > { %v664_v38 = vadd.f32 %v644_v24, %v632_v20 }
 0x33f   : > { %673 = vst.msk [vmem:[#allocation3 + $0x8] sm:$0xff] %vm671_vm2, %v664_v38 }
 0x340   : > { %v650_v41 = vpop.xlane.xlu1 %649 }
 0x341   : > { %v666_v43 = vadd.f32 %v650_v41, %v634_v40 }
 0x343   : > { %675 = vst.msk [vmem:[#allocation3 + $0x18] sm:$0xff] %vm671_vm2, %v666_v43 }
 0x344   : > { %v647_v44 = vpop.xlane.xlu0 %646 }
 0x345   : > { %v665_v46 = vadd.f32 %v647_v44, %v633_v22 }
 0x347   : > { %674 = vst.msk [vmem:[#allocation3 + $0x10] sm:$0xff] %vm671_vm2, %v665_v46 }
 0x348   : > { %v656_v47 = vpop.xlane.xlu1 %655 }
 0x349   : > { %v668_v49 = vadd.f32 %v656_v47, %v636_v32 }
 0x34b   : > { %677 = vst.msk [vmem:[#allocation3 + $0x28] sm:$0xff] %vm671_vm2, %v668_v49 }
 0x34c   : > { %v653_v50 = vpop.xlane.xlu0 %652 }
 0x34d   : > { %v667_v27 = vadd.f32 %v653_v50, %v635_v28 }
 0x34f   : > { %676 = vst.msk [vmem:[#allocation3 + $0x20] sm:$0xff] %vm671_vm2, %v667_v27 }
 0x350   : > { %v659_v52 = vpop.xlane.xlu0 %658 }
 0x351   : > { %v669_v26 = vadd.f32 %v659_v52, %v637_v35 }
 0x353   : > { %678 = vst.msk [vmem:[#allocation3 + $0x30] sm:$0xff] %vm671_vm2, %v669_v26 }
 0x354   : > { %v662_v31 = vpop.xlane.xlu1 %661 }
 0x355   : > { %v670_v29 = vadd.f32 %v662_v31, %v638_v54 }
 0x357   : > { %679 = vst.msk [vmem:[#allocation3 + $0x38] sm:$0xff] %vm671_vm2, %v670_v29 }
 0x358   : > { %v863_v13 = vpop.permute.xlu0 %862  ;;  %v858_v16 = vpop.permute.xlu1 %857 }
 0x359   : > { %v872_v17 = vmul.f32 %v863_v13, %v824_v11  ;;  %v871_v12 = vmul.f32 %v858_v16, %v823_v15 }
 0x372   : > { %v1892_v36 = vpop.f32.mrf.mxu1 }
 0x373   : > { %v874_v33 = vadd.f32 %v1892_v36, %v866_v30 }
 0x374   : > { %v778_v58 = vpop.f32.mrf.mxu1 }
 0x375   : > { %882 = vst [vmem:[#allocation4] sm:$0xff] %v874_v33  ;;  %v873_v59 = vadd.f32 %v865_v57, %v778_v58 }
 0x377   : > { %881 = vst [vmem:[#allocation4 + $0x30] sm:$0xff] %v873_v59 }
 0x37b   : > { %v1895_v62 = vpop.f32.mrf.mxu1 }
 0x37c   : > { %v876_v1 = vadd.f32 %v1895_v62, %v868_v34 }
 0x37d   : > { %v788_v39 = vpop.f32.mrf.mxu1 }
 0x37e   : > { %884 = vst [vmem:[#allocation4 + $0x10] sm:$0xff] %v876_v1  ;;  %v875_v2 = vadd.f32 %v867_v63, %v788_v39 }
 0x380   : > { %883 = vst [vmem:[#allocation4 + $0x18] sm:$0xff] %v875_v2 }
 0x383   : > { %v1898_v5 = vpop.f32.mrf.mxu1 }
 0x384   : > { %v878_v7 = vadd.f32 %v1898_v5, %v870_v37 }
 0x385   : > { %v798_v9 = vpop.f32.mrf.mxu1 }
 0x386   : > { %886 = vst [vmem:[#allocation4 + $0x20] sm:$0xff] %v878_v7  ;;  %v877_v14 = vadd.f32 %v869_v6, %v798_v9 }
 0x388   : > { %885 = vst [vmem:[#allocation4 + $0x8] sm:$0xff] %v877_v14 }
 0x38a   : > { %v1901_v0 = vpop.f32.mrf.mxu1 }
 0x38b   : > { %v880_v19 = vadd.f32 %v1901_v0, %v872_v17 }
 0x38c   : > { %v808_v23 = vpop.f32.mrf.mxu1 }
 0x38d   : > { %888 = vst [vmem:[#allocation4 + $0x38] sm:$0xff] %v880_v19  ;;  %v879_v10 = vadd.f32 %v871_v12, %v808_v23 }
 0x38f   : > { %887 = vst [vmem:[#allocation4 + $0x28] sm:$0xff] %v879_v10 }
 0x390 PF: > { %898 = sbr.rel (%p360_p9) target bundleno = 1655 (0x677), region = 56 }
 0x395   : > { %v922_v8 = vld [vmem:[%s2760_s15 + $0x38] sm:$0xff]  ;;  %v921_v21 = vld [vmem:[%s2760_s15 + $0x30] sm:$0xff]  ;;  %v899_v18 = vld [vmem:[%s2752_s0] sm:$0xff]  ;;  %v1028_v52 = vlaneseq  ;;  %v1037_v31 = vstv %s2788_s3  ;;  %vm1074_vm5 = vcmask 523264   ;;  %vm1243_vm12 = vcmask 7168  }
 0x396   : > { %1902 = vmatprep.subr.mxu0 %v922_v8  ;;  %v907_v20 = vmul.f32 0.088388346, %v899_v18  ;;  %v920_v24 = vld [vmem:[%s2760_s15 + $0x28] sm:$0xff]  ;;  %v919_v25 = vld [vmem:[%s2760_s15 + $0x20] sm:$0xff]  ;;  %v918_v38 = vld [vmem:[%s2760_s15 + $0x18] sm:$0xff]  ;;  %v1048_v29 = vstv %s2791_s13 }
 0x397   : > { %1903 = vmatpush3.xpose.msra.mxu0 %v922_v8  ;;  %v917_v40 = vld [vmem:[%s2760_s15 + $0x10] sm:$0xff]  ;;  %v916_v41 = vld [vmem:[%s2760_s15 + $0x8] sm:$0xff]  ;;  %v915_v42 = vld [vmem:[%s2760_s15] sm:$0xff]  ;;  %v1029_v53 = vshrl.u32 %v1028_v52, 7  ;;  %v1047_v54 = vand.u32 127, %v1028_v52 }
 0x398   : > { %1904 = vmatprep.subr.mxu0 %v921_v21  ;;  %1918 = vmatprep.mubr.f32.mxu0 %v907_v20  ;;  %v900_v43 = vld [vmem:[%s2752_s0 + $0x8] sm:$0xff]  ;;  %v901_v22 = vld [vmem:[%s2752_s0 + $0x10] sm:$0xff]  ;;  %v902_v46 = vld [vmem:[%s2752_s0 + $0x18] sm:$0xff] }
 0x399   : > { %v908_v44 = vmul.f32 0.088388346, %v900_v43  ;;  %v909_v45 = vmul.f32 0.088388346, %v901_v22  ;;  %v903_v32 = vld [vmem:[%s2752_s0 + $0x20] sm:$0xff]  ;;  %v904_v49 = vld [vmem:[%s2752_s0 + $0x28] sm:$0xff]  ;;  %v1038_v55 = vadd.s32 %v1037_v31, %v1029_v53  ;;  %v1049_v36 = vadd.s32 %v1048_v29, %v1047_v54 }
 0x39a   : > { %v910_v47 = vmul.f32 0.088388346, %v902_v46  ;;  %v911_v48 = vmul.f32 0.088388346, %v903_v32  ;;  %v905_v28 = vld [vmem:[%s2752_s0 + $0x30] sm:$0xff]  ;;  %v906_v27 = vld [vmem:[%s2752_s0 + $0x38] sm:$0xff] }
 0x39b   : > { %1905 = vmatpush3.xpose.msra.mxu0 %v921_v21  ;;  %v912_v50 = vmul.f32 0.088388346, %v904_v49  ;;  %v913_v51 = vmul.f32 0.088388346, %v905_v28  ;;  %v914_v35 = vmul.f32 0.088388346, %v906_v27  ;;  %vm1050_vm3 = vcmp.gt.s32.totalorder %v1049_v36, %v1038_v55 }
 0x39c   : > { %1906 = vmatprep.subr.mxu0 %v920_v24  ;;  %v1030_v26 = vadd.s32 8, %v1029_v53  ;;  %v1031_v56 = vadd.s32 16, %v1029_v53  ;;  %v1032_v57 = vadd.s32 24, %v1029_v53  ;;  %v1034_v33 = vadd.s32 40, %v1029_v53  ;;  %v3026_v43 = vld [vmem:[#allocation2 + $0x10] sm:$0xff]  ;;  %v1069_v49 = vld [vmem:[#allocation2 + $0x18] sm:$0xff] }
 0x39d   : > { %v1033_v58 = vadd.s32 32, %v1029_v53  ;;  %v1036_v3 = vadd.s32 56, %v1029_v53  ;;  %v1035_v4 = vadd.s32 48, %v1029_v53  ;;  %v3033_v28 = vld [vmem:[#allocation2 + $0x20] sm:$0xff]  ;;  %v1257_v53 = vld [vmem:[%s2766_s24 + $0x28] sm:$0xff]  ;;  %v3041_v54 = vld [vmem:[#allocation2 + $0x30] sm:$0xff] }
 0x39e   : > { %v1039_v30 = vadd.s32 %v1037_v31, %v1030_v26  ;;  %v1040_v60 = vadd.s32 %v1037_v31, %v1031_v56  ;;  %v1041_v34 = vadd.s32 %v1037_v31, %v1032_v57  ;;  %v1043_v63 = vadd.s32 %v1037_v31, %v1034_v33  ;;  %v1071_v26 = vld [vmem:[#allocation2 + $0x28] sm:$0xff]  ;;  %v1256_v29 = vld [vmem:[%s2766_s24 + $0x20] sm:$0xff] }
 0x39f   : > { %1907 = vmatpush3.xpose.msra.mxu0 %v920_v24  ;;  %v1042_v1 = vadd.s32 %v1037_v31, %v1033_v58  ;;  %v1045_v13 = vadd.s32 %v1037_v31, %v1036_v3  ;;  %v1044_v14 = vadd.s32 %v1037_v31, %v1035_v4  ;;  %v2447_v24 = vmov 0   ;;  %v1255_v58 = vld [vmem:[%s2766_s24 + $0x18] sm:$0xff]  ;;  %v1253_v4 = vld [vmem:[%s2766_s24 + $0x8] sm:$0xff] }
 0x3a0   : > { %1908 = vmatprep.subr.mxu0 %v919_v25  ;;  %vm1051_vm4 = vcmp.gt.s32.totalorder %v1049_v36, %v1039_v30  ;;  %vm1052_vm6 = vcmp.gt.s32.totalorder %v1049_v36, %v1040_v60  ;;  %vm1053_vm7 = vcmp.gt.s32.totalorder %v1049_v36, %v1041_v34  ;;  %vm1055_vm8 = vcmp.gt.s32.totalorder %v1049_v36, %v1043_v63  ;;  %v1254_v34 = vld [vmem:[%s2766_s24 + $0x10] sm:$0xff] }
 0x3a1   : > { %vm1054_vm9 = vcmp.gt.s32.totalorder %v1049_v36, %v1042_v1  ;;  %vm1057_vm10 = vcmp.gt.s32.totalorder %v1049_v36, %v1045_v13  ;;  %vm1056_vm11 = vcmp.gt.s32.totalorder %v1049_v36, %v1044_v14  ;;  %2145 = vset.pattern.permute.xlu0 %v2447_v24  ;;  %2146 = vset.pattern.permute.xlu1 %v2447_v24 }
 0x3a3   : > { %1909 = vmatpush3.xpose.msra.mxu0 %v919_v25 }
 0x3a4   : > { %1910 = vmatprep.subr.mxu0 %v918_v38 }
 0x3a7   : > { %1911 = vmatpush3.xpose.msra.mxu0 %v918_v38  ;;  %v1066_v38 = vld [vmem:[#allocation2] sm:$0xff] }
 0x3a8   : > { %1912 = vmatprep.subr.mxu0 %v917_v40 }
 0x3ab   : > { %1913 = vmatpush3.xpose.msra.mxu0 %v917_v40 }
 0x3ac   : > { %1914 = vmatprep.subr.mxu0 %v916_v41 }
 0x3af   : > { %1915 = vmatpush3.xpose.msra.mxu0 %v916_v41 }
 0x3b0   : > { %1916 = vmatprep.subr.mxu0 %v915_v42 }
 0x3b3   : > { %1917 = vmatpush3.xpose.msra.mxu0 %v915_v42  ;;  %v1067_v42 = vld [vmem:[#allocation2 + $0x8] sm:$0xff] }
 0x3b6   : > { %1919 = vmatmul.mubr.f32.vlgmr.msra.gmra.mxu0 %v908_v44 }
 0x3b7   : > { %1921 = vmatprep.mubr.f32.mxu0 %v909_v45 }
 0x3ba   : > { %1922 = vmatmul.mubr.f32.gmra.mxu0 %v910_v47 }
 0x3bb   : > { %1924 = vmatprep.mubr.f32.mxu0 %v911_v48  ;;  %v1259_v48 = vld [vmem:[%s2766_s24 + $0x38] sm:$0xff] }
 0x3bc   : > { %1930 = vmatprep.subr.mxu1 %v1259_v48 }
 0x3bd   : > { %1931 = vmatpush3.msra.mxu1 %v1259_v48 }
 0x3be   : > { %1925 = vmatmul.mubr.f32.gmra.mxu0 %v912_v50  ;;  %v1258_v50 = vld [vmem:[%s2766_s24 + $0x30] sm:$0xff] }
 0x3bf   : > { %1927 = vmatprep.mubr.f32.mxu0 %v913_v51  ;;  %1932 = vmatprep.subr.mxu1 %v1258_v50 }
 0x3c0   : > { %1933 = vmatpush3.msra.mxu1 %v1258_v50 }
 0x3c1   : > { %1934 = vmatprep.subr.mxu1 %v1257_v53 }
 0x3c2   : > { %1928 = vmatmul.mubr.f32.gmra.mxu0 %v914_v35  ;;  %1935 = vmatpush3.msra.mxu1 %v1257_v53 }
 0x3c3   : > { %1936 = vmatprep.subr.mxu1 %v1256_v29 }
 0x3c4   : > { %1937 = vmatpush3.msra.mxu1 %v1256_v29 }
 0x3c5   : > { %1938 = vmatprep.subr.mxu1 %v1255_v58 }
 0x3c6   : > { %1939 = vmatpush3.msra.mxu1 %v1255_v58 }
 0x3c7   : > { %1940 = vmatprep.subr.mxu1 %v1254_v34 }
 0x3c8   : > { %1941 = vmatpush3.msra.mxu1 %v1254_v34 }
 0x3c9   : > { %1942 = vmatprep.subr.mxu1 %v1253_v4 }
 0x3ca   : > { %1943 = vmatpush3.msra.mxu1 %v1253_v4 }
 0x476   : > { %v1920_v59 = vpop.f32.mrf.mxu0 }
 0x477   : > { %v2998_v37 = vsel %vm1051_vm4, -inf, %v1920_v59  ;;  %v3050_v59 = vld [vmem:[#allocation2 + $0x38] sm:$0xff] }
 0x478   : > { %v989_v61 = vpop.f32.mrf.mxu0  ;;  %v1078_v7 = vsel %vm1074_vm5, %v2998_v37, -inf }
 0x479   : > { %v2994_v62 = vsel %vm1050_vm3, -inf, %v989_v61 }
 0x47a   : > { %v1923_v39 = vpop.f32.mrf.mxu0  ;;  %v1075_v2 = vsel %vm1074_vm5, %v2994_v62, -inf }
 0x47b   : > { %1076 = vmax.xlane.f32.xlu0 %v1075_v2  ;;  %v3006_v15 = vsel %vm1053_vm7, -inf, %v1923_v39 }
 0x47c   : > { %v999_v5 = vpop.f32.mrf.mxu0  ;;  %v1084_v12 = vsel %vm1074_vm5, %v3006_v15, -inf }
 0x47d   : > { %v3000_v6 = vsel %vm1052_vm6, -inf, %v999_v5 }
 0x47e   : > { %v1081_v9 = vsel %vm1074_vm5, %v3000_v6, -inf  ;;  %v1926_v11 = vpop.f32.mrf.mxu0 }
 0x47f   : > { %1079 = vmax.xlane.f32.xlu0 %v1078_v7  ;;  %1082 = vmax.xlane.f32.xlu1 %v1081_v9  ;;  %v3008_v17 = vsel %vm1055_vm8, -inf, %v1926_v11  ;;  %v1252_v7 = vld [vmem:[%s2766_s24] sm:$0xff] }
 0x480   : > { %v1009_v16 = vpop.f32.mrf.mxu0  ;;  %v1090_v10 = vsel %vm1074_vm5, %v3008_v17, -inf  ;;  %1944 = vmatprep.subr.mxu1 %v1252_v7 }
 0x481   : > { %v3010_v0 = vsel %vm1054_vm9, -inf, %v1009_v16  ;;  %1945 = vmatpush3.msra.mxu1 %v1252_v7 }
 0x482   : > { %v1087_v19 = vsel %vm1074_vm5, %v3010_v0, -inf  ;;  %v1929_v23 = vpop.f32.mrf.mxu0 }
 0x483   : > { %1085 = vmax.xlane.f32.xlu1 %v1084_v12  ;;  %1088 = vmax.xlane.f32.xlu0 %v1087_v19  ;;  %v3018_v21 = vsel %vm1057_vm10, -inf, %v1929_v23 }
 0x484   : > { %v1019_v8 = vpop.f32.mrf.mxu0  ;;  %v1096_v25 = vsel %vm1074_vm5, %v3018_v21, -inf }
 0x485   : > { %v3020_v18 = vsel %vm1056_vm11, -inf, %v1019_v8 }
 0x486   : > { %v1093_v20 = vsel %vm1074_vm5, %v3020_v18, -inf }
 0x487   : > { %1091 = vmax.xlane.f32.xlu1 %v1090_v10  ;;  %1094 = vmax.xlane.f32.xlu0 %v1093_v20 }
 0x48b   : > { %1097 = vmax.xlane.f32.xlu1 %v1096_v25 }
 0x504   : > { %v1077_v40 = vpop.xlane.xlu0 %1076 }
 0x505   : > { %v1099_v41 = vmax.f32 %v1066_v38, %v1077_v40 }
 0x507   : > { %v1107_v22 = vsub.f32 %v1066_v38, %v1099_v41  ;;  %1461 = vst.msk [vmem:[#allocation2] sm:$0xff] %vm1243_vm12, %v1099_v41  ;;  %1133 = vperm.xlu0 %2145, %v1099_v41  }
 0x508   : > { %v1080_v44 = vpop.xlane.xlu0 %1079  ;;  %v1083_v45 = vpop.xlane.xlu1 %1082 }
 0x509   : > { %v1115_v46 = vmul.f32 1.442695, %v1107_v22  ;;  %v1100_v32 = vmax.f32 %v1067_v42, %v1080_v44  ;;  %v3030_v47 = vmax.f32 %v3026_v43, %v1083_v45 }
 0x50b   : > { %2147 = vpow2.f32 %v1115_v46  ;;  %1462 = vst.msk [vmem:[#allocation2 + $0x8] sm:$0xff] %vm1243_vm12, %v1100_v32  ;;  %1463 = vst.msk [vmem:[#allocation2 + $0x10] sm:$0xff] %vm1243_vm12, %v3030_v47  ;;  %1138 = vperm.xlu1 %2146, %v1100_v32   ;;  %v1108_v30 = vsub.f32 %v1067_v42, %v1100_v32  ;;  %v1109_v39 = vsub.f32 %v3026_v43, %v3030_v47 }
 0x50c   : > { %v1086_v51 = vpop.xlane.xlu1 %1085  ;;  %v1089_v27 = vpop.xlane.xlu0 %1088 }
 0x50d   : > { %v1102_v35 = vmax.f32 %v1069_v49, %v1086_v51  ;;  %v1103_v52 = vmax.f32 %v3033_v28, %v1089_v27  ;;  %v1117_v1 = vmul.f32 1.442695, %v1108_v30  ;;  %v1119_v11 = vmul.f32 1.442695, %v1109_v39 }
 0x50f   : > { %v1110_v31 = vsub.f32 %v1069_v49, %v1102_v35  ;;  %1464 = vst.msk [vmem:[#allocation2 + $0x18] sm:$0xff] %vm1243_vm12, %v1102_v35  ;;  %1148 = vperm.xlu1 %2146, %v1102_v35   ;;  %1465 = vst.msk [vmem:[#allocation2 + $0x20] sm:$0xff] %vm1243_vm12, %v1103_v52  ;;  %v1111_v13 = vsub.f32 %v3033_v28, %v1103_v52 }
 0x510   : > { %v1092_v55 = vpop.xlane.xlu1 %1091  ;;  %v1095_v56 = vpop.xlane.xlu0 %1094 }
 0x511   : > { %v1121_v36 = vmul.f32 1.442695, %v1110_v31  ;;  %v1104_v57 = vmax.f32 %v1071_v26, %v1092_v55  ;;  %v3047_v33 = vmax.f32 %v3041_v54, %v1095_v56  ;;  %v1123_v14 = vmul.f32 1.442695, %v1111_v13 }
 0x513   : > { %2149 = vpow2.f32 %v1121_v36  ;;  %v1112_v60 = vsub.f32 %v1071_v26, %v1104_v57  ;;  %1466 = vst.msk [vmem:[#allocation2 + $0x28] sm:$0xff] %vm1243_vm12, %v1104_v57  ;;  %1143 = vperm.xlu1 %2146, %v3030_v47   ;;  %v1113_v61 = vsub.f32 %v3041_v54, %v3047_v33  ;;  %1467 = vst.msk [vmem:[#allocation2 + $0x30] sm:$0xff] %vm1243_vm12, %v3047_v33 }
 0x514   : > { %v1098_v63 = vpop.xlane.xlu1 %1097 }
 0x515   : > { %v1125_v2 = vmul.f32 1.442695, %v1112_v60  ;;  %v3062_v3 = vmax.f32 %v3050_v59, %v1098_v63 }
 0x517   : > { %2151 = vpow2.f32 %v1125_v2  ;;  %1158 = vperm.xlu1 %2146, %v1104_v57   ;;  %v1114_v5 = vsub.f32 %v3050_v59, %v3062_v3  ;;  %1468 = vst.msk [vmem:[#allocation2 + $0x38] sm:$0xff] %vm1243_vm12, %v3062_v3  ;;  %v1127_v57 = vmul.f32 1.442695, %v1113_v61  ;;  %v1195_v61 = vld [vmem:[#allocation3] sm:$0xff]  ;;  %v1196_v59 = vld [vmem:[#allocation3 + $0x8] sm:$0xff] }
 0x518   : > { %v3070_v9 = vpop.eup %2147  ;;  %2153 = vpow2.f32 %v1117_v1 }
 0x519   : > { %1399 = vperm.xlu0 %2145, %v3070_v9   ;;  %2155 = vpow2.f32 %v1119_v11  ;;  %v1129_v60 = vmul.f32 1.442695, %v1114_v5  ;;  %v1203_v4 = vmul.f32 %v3070_v9, %v1195_v61 }
 0x51a   : > { %2157 = vpow2.f32 %v1123_v14  ;;  %v1198_v14 = vld [vmem:[#allocation3 + $0x18] sm:$0xff] }
 0x51b   : > { %1153 = vperm.xlu1 %2146, %v1103_v52  }
 0x51f   : > { %1163 = vperm.xlu1 %2146, %v3047_v33  }
 0x520   : > { %v3075_v16 = vpop.eup %2149 }
 0x521   : > { %1414 = vperm.xlu0 %2145, %v3075_v16  }
 0x523   : > { %1168 = vperm.xlu1 %2146, %v3062_v3  }
 0x524   : > { %v3079_v12 = vpop.eup %2151 }
 0x525   : > { %1424 = vperm.xlu0 %2145, %v3079_v12   ;;  %v3082_v19 = vpop.eup %2153 }
 0x526   : > { %v3085_v23 = vpop.eup %2155  ;;  %v1204_v5 = vmul.f32 %v3082_v19, %v1196_v59 }
 0x527   : > { %1404 = vperm.xlu1 %2146, %v3082_v19   ;;  %v3088_v10 = vpop.eup %2157 }
 0x52b   : > { %1409 = vperm.xlu1 %2146, %v3085_v23  }
 0x52f   : > { %1419 = vperm.xlu1 %2146, %v3088_v10  }
 0x582   : > { %v1134_v8 = vpop.permute.xlu0 %1133 }
 0x583   : > { %v1171_v20 = vsub.f32 %v2994_v62, %v1134_v8 }
 0x585   : > { %v1179_v24 = vmul.f32 1.442695, %v1171_v20  ;;  %v1206_v20 = vmul.f32 %v3075_v16, %v1198_v14 }
 0x586   : > { %v1139_v25 = vpop.permute.xlu1 %1138 }
 0x587   : > { %2159 = vpow2.f32 %v1179_v24  ;;  %v1172_v38 = vsub.f32 %v2998_v37, %v1139_v25  ;;  %v1197_v25 = vld [vmem:[#allocation3 + $0x10] sm:$0xff] }
 0x588   : > { %v1205_v9 = vmul.f32 %v3085_v23, %v1197_v25 }
 0x589   : > { %v1181_v40 = vmul.f32 1.442695, %v1172_v38 }
 0x58a   : > { %v1149_v41 = vpop.permute.xlu1 %1148 }
 0x58b   : > { %2161 = vpow2.f32 %v1181_v40  ;;  %v1174_v42 = vsub.f32 %v3006_v15, %v1149_v41  ;;  %v1200_v41 = vld [vmem:[#allocation3 + $0x28] sm:$0xff] }
 0x58c   : > { %v1208_v19 = vmul.f32 %v3079_v12, %v1200_v41 }
 0x58d   : > { %v1185_v43 = vmul.f32 1.442695, %v1174_v42 }
 0x58e   : > { %v1144_v22 = vpop.permute.xlu1 %1143 }
 0x58f   : > { %2163 = vpow2.f32 %v1185_v43  ;;  %v1173_v44 = vsub.f32 %v3000_v6, %v1144_v22  ;;  %v1199_v22 = vld [vmem:[#allocation3 + $0x20] sm:$0xff] }
 0x590   : > { %v1207_v16 = vmul.f32 %v3088_v10, %v1199_v22 }
 0x591   : > { %v1183_v45 = vmul.f32 1.442695, %v1173_v44 }
 0x592   : > { %v1159_v46 = vpop.permute.xlu1 %1158 }
 0x593   : > { %2165 = vpow2.f32 %v1183_v45  ;;  %v1176_v62 = vsub.f32 %v3008_v17, %v1159_v46  ;;  %v1201_v46 = vld [vmem:[#allocation3 + $0x30] sm:$0xff] }
 0x594   : > { %v2160_v32 = vpop.eup %2159  ;;  %v1400_v39 = vpop.permute.xlu0 %1399 }
 0x595   : > { %v1189_v47 = vmul.f32 1.442695, %v1176_v62  ;;  %1946 = vmatprep.mubr.msk.f32.mxu1 %vm1074_vm5, %v2160_v32  ;;  %v1211_v37 = vsel %vm1074_vm5, %v2160_v32, 0.0 }
 0x596   : > { %v1154_v48 = vpop.permute.xlu1 %1153  ;;  %1212 = vadd.xlane.f32.xlu1 %v1211_v37 }
 0x597   : > { %2167 = vpow2.f32 %v1189_v47  ;;  %v1175_v15 = vsub.f32 %v3010_v0, %v1154_v48  ;;  %v1202_v47 = vld [vmem:[#allocation3 + $0x38] sm:$0xff] }
 0x598   : > { %v2162_v49 = vpop.eup %2161 }
 0x599   : > { %v1187_v28 = vmul.f32 1.442695, %v1175_v15  ;;  %1947 = vmatmul.mubr.msk.f32.vlgmr.msra.gmra.mxu1 %vm1074_vm5, %v2162_v49  ;;  %v1214_v6 = vsel %vm1074_vm5, %v2162_v49, 0.0  ;;  %v1390_v49 = vld [vmem:[#allocation4] sm:$0xff] }
 0x59a   : > { %1215 = vadd.xlane.f32.xlu0 %v1214_v6  ;;  %v1164_v50 = vpop.permute.xlu1 %1163 }
 0x59b   : > { %2169 = vpow2.f32 %v1187_v28  ;;  %v1177_v17 = vsub.f32 %v3020_v18, %v1164_v50  ;;  %v1389_v28 = vld [vmem:[#allocation4 + $0x30] sm:$0xff] }
 0x59c   : > { %v2164_v51 = vpop.eup %2163  ;;  %v1415_v54 = vpop.permute.xlu0 %1414  ;;  %v1437_v50 = vmul.f32 %v1400_v39, %v1389_v28 }
 0x59d   : > { %v1191_v27 = vmul.f32 1.442695, %v1177_v17  ;;  %v1220_v35 = vsel %vm1074_vm5, %v2164_v51, 0.0 }
 0x59e   : > { %v1169_v52 = vpop.permute.xlu1 %1168  ;;  %1221 = vadd.xlane.f32.xlu1 %v1220_v35  ;;  %v1392_v35 = vld [vmem:[#allocation4 + $0x10] sm:$0xff] }
 0x59f   : > { %2171 = vpow2.f32 %v1191_v27  ;;  %v1178_v0 = vsub.f32 %v3018_v21, %v1169_v52  ;;  %v1391_v52 = vld [vmem:[#allocation4 + $0x18] sm:$0xff] }
 0x5a0   : > { %v2166_v53 = vpop.eup %2165  ;;  %v1425_v7 = vpop.permute.xlu0 %1424 }
 0x5a1   : > { %v1193_v26 = vmul.f32 1.442695, %v1178_v0  ;;  %1949 = vmatprep.mubr.msk.f32.mxu1 %vm1074_vm5, %v2166_v53  ;;  %v1217_v31 = vsel %vm1074_vm5, %v2166_v53, 0.0  ;;  %v1440_v0 = vmul.f32 %v1415_v54, %v1392_v35 }
 0x5a2   : > { %1218 = vadd.xlane.f32.xlu0 %v1217_v31  ;;  %1950 = vmatmul.mubr.msk.f32.gmra.mxu1 %vm1074_vm5, %v2164_v51  ;;  %v1405_v1 = vpop.permute.xlu1 %1404 }
 0x5a3   : > { %2173 = vpow2.f32 %v1193_v26  ;;  %v1438_v6 = vmul.f32 %v1405_v1, %v1390_v49  ;;  %v1395_v1 = vld [vmem:[#allocation4 + $0x28] sm:$0xff] }
 0x5a4   : > { %v2168_v18 = vpop.eup %2167  ;;  %2175 = vpow2.f32 %v1127_v57 }
 0x5a5   : > { %v1226_v29 = vsel %vm1074_vm5, %v2168_v18, 0.0  ;;  %2177 = vpow2.f32 %v1129_v60  ;;  %v1396_v60 = vld [vmem:[#allocation4 + $0x38] sm:$0xff] }
 0x5a6   : > { %1227 = vadd.xlane.f32.xlu1 %v1226_v29  ;;  %v1410_v2 = vpop.permute.xlu1 %1409 }
 0x5a7   : > { %v1439_v26 = vmul.f32 %v1410_v2, %v1391_v52 }
 0x5a8   : > { %v2170_v55 = vpop.eup %2169 }
 0x5a9   : > { %1952 = vmatprep.mubr.msk.f32.mxu1 %vm1074_vm5, %v2170_v55  ;;  %v1223_v56 = vsel %vm1074_vm5, %v2170_v55, 0.0  ;;  %v1394_v55 = vld [vmem:[#allocation4 + $0x20] sm:$0xff] }
 0x5aa   : > { %1224 = vadd.xlane.f32.xlu0 %v1223_v56  ;;  %1953 = vmatmul.mubr.msk.f32.gmra.mxu1 %vm1074_vm5, %v2168_v18  ;;  %v3121_v33 = vpop.permute.xlu1 %1419  ;;  %v1393_v56 = vld [vmem:[#allocation4 + $0x8] sm:$0xff] }
 0x5ac   : > { %v2172_v21 = vpop.eup %2171 }
 0x5ad   : > { %1955 = vmatprep.mubr.msk.f32.mxu1 %vm1074_vm5, %v2172_v21  ;;  %v1229_v30 = vsel %vm1074_vm5, %v2172_v21, 0.0  ;;  %v1442_v21 = vmul.f32 %v1425_v7, %v1394_v55 }
 0x5ae   : > { %1230 = vadd.xlane.f32.xlu0 %v1229_v30 }
 0x5b0   : > { %v2174_v36 = vpop.eup %2173 }
 0x5b1   : > { %1956 = vmatmul.mubr.msk.f32.gmra.mxu1 %vm1074_vm5, %v2174_v36  ;;  %v1232_v58 = vsel %vm1074_vm5, %v2174_v36, 0.0  ;;  %v2176_v34 = vpop.eup %2175  ;;  %v1441_v36 = vmul.f32 %v3121_v33, %v1393_v56 }
 0x5b2   : > { %1233 = vadd.xlane.f32.xlu1 %v1232_v58  ;;  %v2178_v63 = vpop.eup %2177  ;;  %v1209_v23 = vmul.f32 %v2176_v34, %v1201_v46 }
 0x5b3   : > { %v1210_v48 = vmul.f32 %v2178_v63, %v1202_v47 }
 0x5c3   : > { %1429 = vperm.xlu1 %2146, %v2176_v34  }
 0x5c4   : > { %1434 = vperm.xlu0 %2145, %v2178_v63  }
 0x61f   : > { %v1213_v11 = vpop.xlane.xlu1 %1212 }
 0x620   : > { %v1235_v3 = vadd.f32 %v1213_v11, %v1203_v4 }
 0x622   : > { %1244 = vst.msk [vmem:[#allocation3] sm:$0xff] %vm1243_vm12, %v1235_v3 }
 0x623   : > { %v1216_v13 = vpop.xlane.xlu0 %1215 }
 0x624   : > { %v1236_v8 = vadd.f32 %v1216_v13, %v1204_v5 }
 0x626   : > { %1245 = vst.msk [vmem:[#allocation3 + $0x8] sm:$0xff] %vm1243_vm12, %v1236_v8 }
 0x627   : > { %v1222_v24 = vpop.xlane.xlu1 %1221 }
 0x628   : > { %v1238_v38 = vadd.f32 %v1222_v24, %v1206_v20 }
 0x62a   : > { %1247 = vst.msk [vmem:[#allocation3 + $0x18] sm:$0xff] %vm1243_vm12, %v1238_v38 }
 0x62b   : > { %v1219_v40 = vpop.xlane.xlu0 %1218 }
 0x62c   : > { %v1237_v42 = vadd.f32 %v1219_v40, %v1205_v9 }
 0x62e   : > { %1246 = vst.msk [vmem:[#allocation3 + $0x10] sm:$0xff] %vm1243_vm12, %v1237_v42 }
 0x62f   : > { %v1228_v43 = vpop.xlane.xlu1 %1227 }
 0x630   : > { %v1240_v44 = vadd.f32 %v1228_v43, %v1208_v19 }
 0x632   : > { %1249 = vst.msk [vmem:[#allocation3 + $0x28] sm:$0xff] %vm1243_vm12, %v1240_v44 }
 0x633   : > { %v1225_v45 = vpop.xlane.xlu0 %1224 }
 0x634   : > { %v1239_v62 = vadd.f32 %v1225_v45, %v1207_v16 }
 0x636   : > { %1248 = vst.msk [vmem:[#allocation3 + $0x20] sm:$0xff] %vm1243_vm12, %v1239_v62 }
 0x637   : > { %v1231_v32 = vpop.xlane.xlu0 %1230 }
 0x638   : > { %v1241_v37 = vadd.f32 %v1231_v32, %v1209_v23 }
 0x63a   : > { %1250 = vst.msk [vmem:[#allocation3 + $0x30] sm:$0xff] %vm1243_vm12, %v1241_v37 }
 0x63b   : > { %v1234_v12 = vpop.xlane.xlu1 %1233 }
 0x63c   : > { %v1242_v15 = vadd.f32 %v1234_v12, %v1210_v48 }
 0x63e   : > { %1251 = vst.msk [vmem:[#allocation3 + $0x38] sm:$0xff] %vm1243_vm12, %v1242_v15 }
 0x63f   : > { %v1435_v34 = vpop.permute.xlu0 %1434  ;;  %v1430_v39 = vpop.permute.xlu1 %1429 }
 0x640   : > { %v1444_v2 = vmul.f32 %v1435_v34, %v1396_v60  ;;  %v1443_v61 = vmul.f32 %v1430_v39, %v1395_v1 }
 0x659   : > { %v1948_v10 = vpop.f32.mrf.mxu1 }
 0x65a   : > { %v1446_v17 = vadd.f32 %v1948_v10, %v1438_v6 }
 0x65b   : > { %v1350_v51 = vpop.f32.mrf.mxu1 }
 0x65c   : > { %1454 = vst [vmem:[#allocation4] sm:$0xff] %v1446_v17  ;;  %v1445_v27 = vadd.f32 %v1437_v50, %v1350_v51 }
 0x65e   : > { %1453 = vst [vmem:[#allocation4 + $0x30] sm:$0xff] %v1445_v27 }
 0x662   : > { %v1951_v53 = vpop.f32.mrf.mxu1 }
 0x663   : > { %v1448_v31 = vadd.f32 %v1951_v53, %v1440_v0 }
 0x664   : > { %v1360_v18 = vpop.f32.mrf.mxu1 }
 0x665   : > { %1456 = vst [vmem:[#allocation4 + $0x10] sm:$0xff] %v1448_v31  ;;  %v1447_v29 = vadd.f32 %v1439_v26, %v1360_v18 }
 0x667   : > { %1455 = vst [vmem:[#allocation4 + $0x18] sm:$0xff] %v1447_v29 }
 0x66a   : > { %v1954_v30 = vpop.f32.mrf.mxu1 }
 0x66b   : > { %v1450_v57 = vadd.f32 %v1954_v30, %v1442_v21 }
 0x66c   : > { %v1370_v58 = vpop.f32.mrf.mxu1 }
 0x66d   : > { %1458 = vst [vmem:[#allocation4 + $0x20] sm:$0xff] %v1450_v57  ;;  %v1449_v63 = vadd.f32 %v1441_v36, %v1370_v58 }
 0x66f   : > { %1457 = vst [vmem:[#allocation4 + $0x8] sm:$0xff] %v1449_v63 }
 0x671   : > { %v1957_v54 = vpop.f32.mrf.mxu1 }
 0x672   : > { %v1452_v4 = vadd.f32 %v1957_v54, %v1444_v2 }
 0x673   : > { %v1380_v11 = vpop.f32.mrf.mxu1 }
 0x674   : > { %1460 = vst [vmem:[#allocation4 + $0x38] sm:$0xff] %v1452_v4  ;;  %v1451_v59 = vadd.f32 %v1443_v61, %v1380_v11 }
 0x676   : > { %1459 = vst [vmem:[#allocation4 + $0x28] sm:$0xff] %v1451_v59 }
 0x677 PF: > { %s3323_s30 = sld [smem:[#allocation18_spill]] }
 0x67d   : > { %p1774_p13 = scmp.ne.s32.totalorder %s3323_s30, 3 }
 0x67f   : > { %1472 = sbr.rel (%p1774_p13) target bundleno = 1823 (0x71f), region = 60 }
 0x684   : > { %v1475_v33 = vld [vmem:[#allocation3 + $0x10] sm:$0xff]  ;;  %v1473_v7 = vld [vmem:[#allocation3] sm:$0xff]  ;;  %v1476_v3 = vld [vmem:[#allocation3 + $0x18] sm:$0xff]  ;;  %v2448_v5 = vmov 0  }
 0x685   : > { %2180 = vset.pattern.permute.xlu1 %v2448_v5  ;;  %2179 = vset.pattern.permute.xlu0 %v2448_v5  ;;  %2181 = vrcp.f32 %v1475_v33  ;;  %v1474_v13 = vld [vmem:[#allocation3 + $0x8] sm:$0xff]  ;;  %v1477_v8 = vld [vmem:[#allocation3 + $0x20] sm:$0xff]  ;;  %v1480_v20 = vld [vmem:[#allocation3 + $0x38] sm:$0xff] }
 0x686   : > { %2183 = vrcp.f32 %v1473_v7  ;;  %v1478_v14 = vld [vmem:[#allocation3 + $0x28] sm:$0xff]  ;;  %v1479_v24 = vld [vmem:[#allocation3 + $0x30] sm:$0xff]  ;;  %v1491_v22 = vld [vmem:[#allocation4 + $0x18] sm:$0xff] }
 0x687   : > { %2185 = vrcp.f32 %v1476_v3  ;;  %v1489_v44 = vld [vmem:[#allocation4 + $0x30] sm:$0xff]  ;;  %v1490_v32 = vld [vmem:[#allocation4] sm:$0xff]  ;;  %v1493_v49 = vld [vmem:[#allocation4 + $0x8] sm:$0xff] }
 0x688   : > { %2187 = vrcp.f32 %v1474_v13  ;;  %v1492_v23 = vld [vmem:[#allocation4 + $0x10] sm:$0xff]  ;;  %v1494_v15 = vld [vmem:[#allocation4 + $0x20] sm:$0xff]  ;;  %v1496_v17 = vld [vmem:[#allocation4 + $0x38] sm:$0xff] }
 0x689   : > { %2189 = vrcp.f32 %v1478_v14  ;;  %v1495_v51 = vld [vmem:[#allocation4 + $0x28] sm:$0xff] }
 0x68a   : > { %2191 = vrcp.f32 %v1477_v8 }
 0x68b   : > { %2193 = vrcp.f32 %v1480_v20 }
 0x68c   : > { %2195 = vrcp.f32 %v1479_v24 }
 0x692   : > { %v2182_v25 = vpop.eup %2181 }
 0x693   : > { %v2184_v38 = vpop.eup %2183  ;;  %1509 = vperm.xlu1 %2180, %v2182_v25  }
 0x694   : > { %v2186_v9 = vpop.eup %2185  ;;  %1499 = vperm.xlu0 %2179, %v2184_v38  }
 0x695   : > { %v2188_v40 = vpop.eup %2187 }
 0x696   : > { %v2190_v41 = vpop.eup %2189 }
 0x697   : > { %1514 = vperm.xlu1 %2180, %v2186_v9   ;;  %v2192_v42 = vpop.eup %2191 }
 0x698   : > { %1504 = vperm.xlu0 %2179, %v2188_v40   ;;  %v2194_v19 = vpop.eup %2193 }
 0x699   : > { %v2196_v43 = vpop.eup %2195 }
 0x69b   : > { %1524 = vperm.xlu1 %2180, %v2190_v41  }
 0x69c   : > { %1519 = vperm.xlu0 %2179, %v2192_v42  }
 0x69f   : > { %1534 = vperm.xlu1 %2180, %v2194_v19  }
 0x6a0   : > { %1529 = vperm.xlu0 %2179, %v2196_v43  }
 0x70e   : > { %v1510_v16 = vpop.permute.xlu1 %1509 }
 0x70f   : > { %v1539_v45 = vmul.f32 %v1510_v16, %v1491_v22  ;;  %v1500_v46 = vpop.permute.xlu0 %1499 }
 0x710   : > { %v1537_v62 = vmul.f32 %v1500_v46, %v1489_v44 }
 0x711   : > { %1547 = vst [vmem:[%s2768_s27 + $0x10] sm:$0xff] %v1539_v45 }
 0x712   : > { %1545 = vst [vmem:[%s2768_s27] sm:$0xff] %v1537_v62  ;;  %v1515_v47 = vpop.permute.xlu1 %1514 }
 0x713   : > { %v1540_v37 = vmul.f32 %v1515_v47, %v1492_v23  ;;  %v1505_v48 = vpop.permute.xlu0 %1504 }
 0x714   : > { %v1538_v12 = vmul.f32 %v1505_v48, %v1490_v32 }
 0x715   : > { %1548 = vst [vmem:[%s2768_s27 + $0x18] sm:$0xff] %v1540_v37 }
 0x716   : > { %1546 = vst [vmem:[%s2768_s27 + $0x8] sm:$0xff] %v1538_v12  ;;  %v1525_v28 = vpop.permute.xlu1 %1524 }
 0x717   : > { %v1542_v6 = vmul.f32 %v1525_v28, %v1494_v15  ;;  %v1520_v10 = vpop.permute.xlu0 %1519 }
 0x718   : > { %v1541_v50 = vmul.f32 %v1520_v10, %v1493_v49 }
 0x719   : > { %1550 = vst [vmem:[%s2768_s27 + $0x28] sm:$0xff] %v1542_v6 }
 0x71a   : > { %1549 = vst [vmem:[%s2768_s27 + $0x20] sm:$0xff] %v1541_v50  ;;  %v1535_v27 = vpop.permute.xlu1 %1534 }
 0x71b   : > { %v1544_v35 = vmul.f32 %v1535_v27, %v1496_v17  ;;  %v1530_v52 = vpop.permute.xlu0 %1529 }
 0x71c   : > { %v1543_v0 = vmul.f32 %v1530_v52, %v1495_v51 }
 0x71d   : > { %1552 = vst [vmem:[%s2768_s27 + $0x38] sm:$0xff] %v1544_v35 }
 0x71e   : > { %1551 = vst [vmem:[%s2768_s27 + $0x30] sm:$0xff] %v1543_v0 }
 0x71f PF: > { %s3324_s19 = sld [smem:[#allocation19_spill]]  ;;  %s1571_s2 = sshll.u32 %s2768_s27, 4  ;;  %s3151_s2 = int_to_ptr.vmem [resolvable:$true] %s1571_s2 }
 0x720   : > { %s3325_s7 = sld [smem:[#allocation20_spill]]  ;;  %s1554_s13 = scalar_lea.sflag [#allocation7], %s2748_s12 }
 0x721   : > { %s3326_s0 = sld [smem:[#allocation21_spill]]  ;;  %s2281_s8 = scalar_lea.vmem %s3151_s2, 1024 }
 0x722   : > { %s3327_s9 = sld [smem:[#allocation29_spill]]  ;;  %p2282_p6 = scmp.ne.s32.totalorder %s3151_s2, %s2281_s8 }
 0x723   : > { %s3328_s20 = sld [smem:[#allocation36_spill]]  ;;  %s2449_s21 = smov [#allocation11]  }
 0x724   : > { %s2285_s27 = sshll.u32 %s2449_s21, 4  ;;  %s2286_s27 = int_to_ptr.vmem [resolvable:$false] %s2285_s27 }
 0x725   : > { %s1776_s16 = sshll.u32 %s3324_s19, 3  ;;  %s2287_s18 = scalar_lea.vmem %s2286_s27, 2048 }
 0x726   : > { %s1777_s5 = sshll.u32 %s3325_s7, 5  ;;  %p2288_p2 = scmp.lt.s32.totalorder %s3151_s2, %s2286_s27 }
 0x727   : > { %s1778_s11 = sshll.u32 %s3326_s0, 7  ;;  %s1566_s1 = sadd.s32 %s1777_s5, %s1776_s16 }
 0x728   : > { %s1568_s23 = sadd.s32 %s1778_s11, %s1566_s1  ;;  %p3330_p7 = scmp.ne.s32.totalorder %s3327_s9, 0 }
 0x729   : > { %s1779_s15 = sshll.u32 %s1568_s23, 7  ;;  %s3329_s6 = smov %s3328_s20 }
 0x72a   : > { %s3156_s3 = scalar_lea.hbm %s3328_s20, %s1779_s15  ;;  %p2283_p5 = pnand %p2282_p6, %p3330_p7 }
 0x72b   : > { %p2289_p10 = scmp.lt.s32.totalorder %s2287_s18, %s2281_s8 }
 0x72c   : > { %p2284_p11 = pneg %p2283_p5 }
 0x72d   : > { %p2290_p1 = por %p2289_p10, %p2288_p2 }
 0x72f   : > { %p2291_p3 = pnand %p2290_p1, %p2284_p11 }
 0x731   : > { %2294 = shalt.err (!%p2291_p3)
}
 0x732   : > { %s2295_s4 = scalar_lea.hbm %s3156_s3, 1024  ;;  %s2299_s7 = scalar_lea.hbm %s3329_s6, 32768 }
 0x733   : > { %p2296_p8 = scmp.ne.s32.totalorder %s3156_s3, %s2295_s4  ;;  %p2300_p4 = scmp.lt.s32.totalorder %s3156_s3, %s3329_s6 }
 0x734   : > { %p2301_p9 = scmp.lt.s32.totalorder %s2299_s7, %s2295_s4 }
 0x735   : > { %p2297_p12 = pnand %p2296_p8, %p3330_p7 }
 0x736   : > { %p2302_p13 = por %p2301_p9, %p2300_p4 }
 0x737   : > { %p2298_p0 = pneg %p2297_p12 }
 0x739   : > { %p2303_p6 = pnand %p2302_p13, %p2298_p0 }
 0x73b   : > { %2306 = shalt.err (!%p2303_p6)
}
 0x73c   : > { %s2450_s5 = smov 128   ;;  %s2451_s11 = smov 8  }
 0x73d   : > { %1964 = dma.vmem_to_hbm [thread:$0]  (%p3330_p7), %s3151_s2, 1024, %s3156_s3, %s1554_s13, %s2450_s5, %s2450_s5, %s2451_s11  }
 0x73e PF: > { %s3331_s1 = sld [smem:[#allocation16_spill]]  ;;  %p1981_p5 = scmp.ge.s32.totalorder %s2437_s26, 2 }
 0x73f   : > { %s3332_s23 = sld [smem:[#allocation31_spill]] }
 0x744   : > { %s1586_s15 = sand.u32 1, %s3331_s1  }
 0x745   : > { %p3333_p11 = scmp.ne.s32.totalorder %s3332_s23, 0  ;;  %s1587_s24 = scalar_lea.sflag [#allocation7], %s1586_s15 }
 0x747   : > { %p1977_p2 = pnand %p1981_p5, %p3333_p11 }
 0x749   : > { %p1978_p10 = pneg %p1977_p2 }
 0x74b   : > { %2376 = dma.done.wait (%p1978_p10), %s1587_s24, 1024  }
 0x74c   : > { %2378 = vsyncadd (%p1978_p10), %s1587_s24, 4294966272  ;;  %s22_s26 = sadd.s32 1, %s2437_s26   ;;  %s3335_s12 = sld [smem:[#allocation15_spill]] }
 0x74d   : > { %p3186_p1 = scmp.ge.s32.totalorder %s22_s26, 130   ;;  %s3336_s15 = sld [smem:[#allocation17_spill]] }
 0x74e   : > { %s3337_s19 = sld [smem:[#allocation22_spill]]  ;;  %s3343_s13 = smov %s2389_s14 }
 0x74f   : > { %s3338_s20 = sld [smem:[#allocation23_spill]]  ;;  %s3344_s14 = smov %s2705_s29 }
 0x750   : > { %s3339_s21 = sld [smem:[#allocation24_spill]]  ;;  %s3345_s16 = smov %s2401_s17 }
 0x751   : > { %s3340_s23 = sld [smem:[#allocation27_spill]]  ;;  %s3346_s17 = smov %s2700_s25 }
 0x752   : > { %s3341_s24 = sld [smem:[#allocation30_spill]]  ;;  %s3347_s18 = smov %s2421_s22 }
 0x753   : > { %s3342_s9 = sld [smem:[#allocation32_spill]]  ;;  %s3348_s22 = smov %s3351_s28 }
 0x755   :  { %21 = sbr.rel (!%p3186_p1) target bundleno = 18 (0x12), region = 117 }
 0x759   : > { %s3349_s25 = smov %s3342_s9 }
 0x75a   :  { %1592 = vsyncpa [#allocation6], 1 }
 0x75b   :  { %1594 = vsyncpa [#allocation6 + $0x1], 1 }
 0x75c   :  { %1595 = vsyncpa [#allocation9], 1 }
 0x75d   :  { %1597 = vsyncpa [#allocation9 + $0x1], 1 }
 0x75e   :  { %1598 = vsyncpa [#allocation7], 1 }
 0x75f   :  { %1600 = vsyncpa [#allocation7 + $0x1], 1 }

</bundles_post_ra>
